<compile_context>
chip_gen: v6e
topology: v6e:2x2x1
jax: 0.10.0
libtpu: 0.0.40
codegen_flags: <defaults>
</compile_context>

<pallas_src>
import jax
import jax.numpy as jnp
from jax.experimental import pallas as pl
from jax.experimental.pallas import tpu as pltpu

_EPS = 1e-5


def _vmem_capacity_bytes():
    """Physical VMEM of the current generation (conservative fallback = v7x)."""
    try:
        return int(pltpu.get_tpu_info().vmem_capacity_bytes)
    except Exception:
        return 64 << 20


def _pick_c_blk(N, C, HW, in_item, out_item, p_item, budget_bytes):
    """Largest channel block whose per-step VMEM footprint fits the budget.

    Valid block sizes divide C and either equal C or are a multiple of the
    sublane tile for this dtype (BlockSpec second-to-last-dim constraint).
    Returns (c_blk, footprint_bytes).
    """
    sub = 8 * max(1, 4 // in_item)          # 8 (f32), 16 (bf16), 32 (int8)
    valid = [c for c in range(1, C + 1)
             if C % c == 0 and (c == C or c % sub == 0)]
    p_bytes = 2 * HW * 4 * HW * p_item      # double-buffered constant operand

    def foot(cb):
        blk = N * cb * HW
        return (2 * blk * in_item           # double-buffered input block
                + 2 * blk * 4 * out_item    # double-buffered (4x) output block
                + p_bytes
                + blk * 4 * 8)              # f32 compute intermediates headroom

    fitting = [c for c in valid if foot(c) <= budget_bytes]
    cb = max(fitting) if fitting else min(valid)
    return cb, foot(cb)


def _make_kernel(N, c_blk, HW, eps):
    inv_count = 1.0 / float(N * HW)

    def kernel(g_ref, b_ref, p_ref, x_ref, o_ref):
        # g_ref, b_ref : (1, C_blk, 1)       per-channel affine params
        # p_ref        : (HW, 4*HW)          0/1 flat-upsample operator
        # x_ref        : (N, C_blk, HW)      input block (full N, full spatial)
        # o_ref        : (N, C_blk, 4*HW)    final (flattened-spatial) output
        f32 = jnp.float32
        xf = x_ref[...].astype(f32)                                # (N, Cb, HW)

        # Two-pass (cancellation-robust) per-channel batch statistics.
        s = jnp.sum(jnp.sum(xf, axis=2, keepdims=True), axis=0, keepdims=True)
        mean = s * inv_count                                       # (1, Cb, 1)
        d = xf - mean
        var = jnp.sum(jnp.sum(d * d, axis=2, keepdims=True),
                      axis=0, keepdims=True) * inv_count           # biased
        inv_std = jax.lax.rsqrt(var + eps)

        scale = inv_std * g_ref[...].astype(f32)                   # (1, Cb, 1)
        shift = b_ref[...].astype(f32) - mean * scale
        y = xf * scale + shift                                     # (N, Cb, HW)

        # Nearest-2x upsample of the flattened spatial axis as one 0/1 matmul
        # per batch element: (Cb, HW) @ (HW, 4HW) -> lane-dense (Cb, 4HW).
        p = p_ref[...]
        for n in range(N):                       # N = batch, small; Cb batched
            up = jnp.dot(y[n].astype(p.dtype), p, preferred_element_type=f32)
            o_ref[n] = up.astype(o_ref.dtype)

    return kernel


@jax.jit
def up_bn2d(x, gamma, beta):
    """Up_Bn2D.forward: nearest 2x upsample followed by BatchNorm2d (training)."""
    N, C, H, W = x.shape
    HW = H * W
    in_item = jnp.dtype(x.dtype).itemsize
    out_item = in_item
    mm_dtype = jnp.bfloat16 if x.dtype == jnp.bfloat16 else jnp.float32
    p_item = jnp.dtype(mm_dtype).itemsize

    capacity = _vmem_capacity_bytes()
    budget = (2 * capacity) // 5                       # ~25 MiB v7x, ~51 MiB v6e
    c_blk, foot = _pick_c_blk(N, C, HW, in_item, out_item, p_item, budget)
    if foot > int(0.9 * capacity):
        # TODO(synk): add an (H, 4W)-view, H-tiled fallback kernel for spatial
        # shapes whose flattened 0/1 operator / blocks cannot fit in VMEM.
        raise NotImplementedError(
            "spatial extent too large for the flattened-upsample Pallas kernel")

    n_blocks = C // c_blk
    vmem_limit = int(min(0.9 * capacity, max(foot + (16 << 20), 32 << 20)))

    # 0/1 permutation operator: flat row-major index j of the (2H, 2W) image
    # is sourced from flat index (j//(2W)//2)*W + (j%(2W))//2 of the (H, W) one.
    j = jnp.arange(4 * HW, dtype=jnp.int32)
    src = (j // (2 * W) // 2) * W + (j % (2 * W)) // 2
    P = (jnp.arange(HW, dtype=jnp.int32)[:, None] == src[None, :]).astype(mm_dtype)

    x3 = x.reshape(N, C, HW)                                   # free view
    g3 = gamma.astype(jnp.float32).reshape(n_blocks, c_blk, 1)
    b3 = beta.astype(jnp.float32).reshape(n_blocks, c_blk, 1)

    out3 = pl.pallas_call(
        _make_kernel(N, c_blk, HW, _EPS),
        out_shape=jax.ShapeDtypeStruct((N, C, 4 * HW), x.dtype),
        grid_spec=pltpu.PrefetchScalarGridSpec(
            num_scalar_prefetch=0,
            grid=(n_blocks,),
            in_specs=[
                pl.BlockSpec((1, c_blk, 1), lambda c: (c, 0, 0)),       # gamma
                pl.BlockSpec((1, c_blk, 1), lambda c: (c, 0, 0)),       # beta
                pl.BlockSpec((HW, 4 * HW), lambda c: (0, 0)),           # P (const)
                pl.BlockSpec((N, c_blk, HW), lambda c: (0, c, 0)),      # x
            ],
            out_specs=pl.BlockSpec((N, c_blk, 4 * HW), lambda c: (0, c, 0)),
        ),
        compiler_params=pltpu.CompilerParams(
            dimension_semantics=("parallel",),
            vmem_limit_bytes=vmem_limit,
        ),
    )(g3, b3, P, x3)

    # Flat 4*HW spatial is exactly row-major (2H, 2W): this reshape is a view.
    return out3.reshape(N, C, 2 * H, 2 * W)


def up_bn2d_ref(x, gamma, beta):
    """Pure-JAX reference mirroring torch: bn(up(x)) in training mode."""
    up = jnp.repeat(jnp.repeat(x, 2, axis=2), 2, axis=3)
    mean = jnp.mean(up, axis=(0, 2, 3), keepdims=True)
    var = jnp.mean((up - mean) ** 2, axis=(0, 2, 3), keepdims=True)
    out = (up - mean) / jnp.sqrt(var + _EPS)
    return out * gamma[None, :, None, None] + beta[None, :, None, None]


if __name__ == "__main__":
    key = jax.random.PRNGKey(0)
    k_x, k_g, k_b = jax.random.split(key, 3)

    N, C, H, W = 2, 4, 16, 16
    # Non-zero-mean input exercises the variance-robustness path.
    x = jax.random.normal(k_x, (N, C, H, W), dtype=jnp.float32) * 2.0 + 3.0
    # nn.BatchNorm2d init is weight=1 / bias=0; perturb to exercise the affine.
    gamma = 1.0 + 0.1 * jax.random.normal(k_g, (C,), dtype=jnp.float32)
    beta = 0.1 * jax.random.normal(k_b, (C,), dtype=jnp.float32)

    out = jax.block_until_ready(up_bn2d(x, gamma, beta))

    ref = up_bn2d_ref(x, gamma, beta)
    assert out.shape == (N, C, 2 * H, 2 * W), out.shape
    assert bool(jnp.allclose(out, ref, rtol=1e-4, atol=1e-4)), "mismatch vs reference"

    print("KERNEL_OK")
</pallas_src>

<mosaic_0001>
module attributes {stable_mosaic.version = 11 : i64} {
  func.func @kernel(%arg0: i32, %arg1: memref<1x4x1xf32, #tpu.memory_space<vmem>>, %arg2: memref<1x4x1xf32, #tpu.memory_space<vmem>>, %arg3: memref<256x1024xf32, #tpu.memory_space<vmem>>, %arg4: memref<2x4x256xf32, #tpu.memory_space<vmem>>, %arg5: memref<2x4x1024xf32, #tpu.memory_space<vmem>>) attributes {dimension_semantics = [#tpu.dimension_semantics<parallel>], iteration_bounds = array<i64: 1>, scalar_prefetch = 0 : i64, scratch_operands = 0 : i64, tpu.core_type = #tpu.core_type<tc>, window_params = [{transform_indices = @transform_0, window_bounds = array<i64: 1, 4, 1>}, {transform_indices = @transform_1, window_bounds = array<i64: 1, 4, 1>}, {pipeline_mode = #tpu.pipeline_mode<synchronous>, transform_indices = @transform_2, window_bounds = array<i64: 256, 1024>}, {transform_indices = @transform_3, window_bounds = array<i64: 2, 4, 256>}, {transform_indices = @transform_4, window_bounds = array<i64: 2, 4, 1024>}]} {
    %c0 = arith.constant 0 : index
    %c0_0 = arith.constant 0 : index
    %c0_1 = arith.constant 0 : index
    %0 = vector.load %arg4[%c0, %c0_0, %c0_1] : memref<2x4x256xf32, #tpu.memory_space<vmem>>, vector<2x4x256xf32>
    %cst = arith.constant dense<0.000000e+00> : vector<2x4xf32>
    %1 = vector.multi_reduction <add>, %0, %cst [2] : vector<2x4x256xf32> to vector<2x4xf32>
    %2 = vector.shape_cast %1 : vector<2x4xf32> to vector<2x4x1xf32>
    %cst_2 = arith.constant dense<0.000000e+00> : vector<4x1xf32>
    %3 = vector.multi_reduction <add>, %2, %cst_2 [0] : vector<2x4x1xf32> to vector<4x1xf32>
    %4 = vector.shape_cast %3 : vector<4x1xf32> to vector<1x4x1xf32>
    %cst_3 = arith.constant 0.001953125 : f32
    %5 = vector.broadcast %cst_3 : f32 to vector<1x4x1xf32>
    %6 = arith.mulf %4, %5 : vector<1x4x1xf32>
    %7 = vector.broadcast %6 : vector<1x4x1xf32> to vector<2x4x256xf32>
    %8 = arith.subf %0, %7 : vector<2x4x256xf32>
    %9 = arith.mulf %8, %8 : vector<2x4x256xf32>
    %cst_4 = arith.constant dense<0.000000e+00> : vector<2x4xf32>
    %10 = vector.multi_reduction <add>, %9, %cst_4 [2] : vector<2x4x256xf32> to vector<2x4xf32>
    %11 = vector.shape_cast %10 : vector<2x4xf32> to vector<2x4x1xf32>
    %cst_5 = arith.constant dense<0.000000e+00> : vector<4x1xf32>
    %12 = vector.multi_reduction <add>, %11, %cst_5 [0] : vector<2x4x1xf32> to vector<4x1xf32>
    %13 = vector.shape_cast %12 : vector<4x1xf32> to vector<1x4x1xf32>
    %cst_6 = arith.constant 0.001953125 : f32
    %14 = vector.broadcast %cst_6 : f32 to vector<1x4x1xf32>
    %15 = arith.mulf %13, %14 : vector<1x4x1xf32>
    %cst_7 = arith.constant 9.99999974E-6 : f32
    %16 = vector.broadcast %cst_7 : f32 to vector<1x4x1xf32>
    %17 = arith.addf %15, %16 : vector<1x4x1xf32>
    %18 = math.rsqrt %17 : vector<1x4x1xf32>
    %c0_8 = arith.constant 0 : index
    %c0_9 = arith.constant 0 : index
    %c0_10 = arith.constant 0 : index
    %19 = vector.load %arg1[%c0_8, %c0_9, %c0_10] : memref<1x4x1xf32, #tpu.memory_space<vmem>>, vector<1x4x1xf32>
    %20 = arith.mulf %18, %19 : vector<1x4x1xf32>
    %c0_11 = arith.constant 0 : index
    %c0_12 = arith.constant 0 : index
    %c0_13 = arith.constant 0 : index
    %21 = vector.load %arg2[%c0_11, %c0_12, %c0_13] : memref<1x4x1xf32, #tpu.memory_space<vmem>>, vector<1x4x1xf32>
    %22 = arith.mulf %6, %20 : vector<1x4x1xf32>
    %23 = arith.subf %21, %22 : vector<1x4x1xf32>
    %24 = vector.broadcast %20 : vector<1x4x1xf32> to vector<2x4x256xf32>
    %25 = arith.mulf %0, %24 : vector<2x4x256xf32>
    %26 = vector.broadcast %23 : vector<1x4x1xf32> to vector<2x4x256xf32>
    %27 = arith.addf %25, %26 : vector<2x4x256xf32>
    %c0_14 = arith.constant 0 : index
    %c0_15 = arith.constant 0 : index
    %28 = vector.load %arg3[%c0_14, %c0_15] : memref<256x1024xf32, #tpu.memory_space<vmem>>, vector<256x1024xf32>
    %29 = vector.extract_strided_slice %27 {offsets = [0, 0, 0], sizes = [1, 4, 256], strides = [1, 1, 1]} : vector<2x4x256xf32> to vector<1x4x256xf32>
    %30 = vector.shape_cast %29 : vector<1x4x256xf32> to vector<4x256xf32>
    %cst_16 = arith.constant dense<0.000000e+00> : vector<4x1024xf32>
    %31 = tpu.matmul %30, %28, %cst_16 {dimension_numbers = #tpu.dot_dimension_numbers<[1], [0], [0], [1], [0, 0, 1, 1], [], []>} : vector<4x256xf32>, vector<256x1024xf32>, vector<4x1024xf32> -> vector<4x1024xf32>
    %c0_17 = arith.constant 0 : index
    %c0_18 = arith.constant 0 : index
    %c0_19 = arith.constant 0 : index
    %32 = vector.load %arg5[%c0_17, %c0_18, %c0_19] : memref<2x4x1024xf32, #tpu.memory_space<vmem>>, vector<1x4x1024xf32>
    %33 = vector.shape_cast %32 : vector<1x4x1024xf32> to vector<4x1024xf32>
    %34 = vector.shape_cast %31 : vector<4x1024xf32> to vector<1x4x1024xf32>
    tpu.vector_store %arg5[%c0_17, %c0_18, %c0_19], %34 {strides = array<i32>} : memref<2x4x1024xf32, #tpu.memory_space<vmem>>, vector<1x4x1024xf32>,
    %35 = vector.extract_strided_slice %27 {offsets = [1, 0, 0], sizes = [1, 4, 256], strides = [1, 1, 1]} : vector<2x4x256xf32> to vector<1x4x256xf32>
    %36 = vector.shape_cast %35 : vector<1x4x256xf32> to vector<4x256xf32>
    %cst_20 = arith.constant dense<0.000000e+00> : vector<4x1024xf32>
    %37 = tpu.matmul %36, %28, %cst_20 {dimension_numbers = #tpu.dot_dimension_numbers<[1], [0], [0], [1], [0, 0, 1, 1], [], []>} : vector<4x256xf32>, vector<256x1024xf32>, vector<4x1024xf32> -> vector<4x1024xf32>
    %c1 = arith.constant 1 : index
    %c0_21 = arith.constant 0 : index
    %c0_22 = arith.constant 0 : index
    %38 = vector.load %arg5[%c1, %c0_21, %c0_22] : memref<2x4x1024xf32, #tpu.memory_space<vmem>>, vector<1x4x1024xf32>
    %39 = vector.shape_cast %38 : vector<1x4x1024xf32> to vector<4x1024xf32>
    %40 = vector.shape_cast %37 : vector<4x1024xf32> to vector<1x4x1024xf32>
    tpu.vector_store %arg5[%c1, %c0_21, %c0_22], %40 {strides = array<i32>} : memref<2x4x1024xf32, #tpu.memory_space<vmem>>, vector<1x4x1024xf32>,
    return
  }
  func.func @transform_0(%arg0: i32) -> (i32, i32, i32) {
    %c0_i32 = arith.constant 0 : i32
    %c0_i32_0 = arith.constant 0 : i32
    %c0_i32_1 = arith.constant 0 : i32
    return %arg0, %c0_i32, %c0_i32_0 : i32, i32, i32
  }
  func.func @transform_1(%arg0: i32) -> (i32, i32, i32) {
    %c0_i32 = arith.constant 0 : i32
    %c0_i32_0 = arith.constant 0 : i32
    %c0_i32_1 = arith.constant 0 : i32
    return %arg0, %c0_i32, %c0_i32_0 : i32, i32, i32
  }
  func.func @transform_2(%arg0: i32) -> (i32, i32) {
    %c0_i32 = arith.constant 0 : i32
    %c0_i32_0 = arith.constant 0 : i32
    %c0_i32_1 = arith.constant 0 : i32
    return %c0_i32, %c0_i32_0 : i32, i32
  }
  func.func @transform_3(%arg0: i32) -> (i32, i32, i32) {
    %c0_i32 = arith.constant 0 : i32
    %c0_i32_0 = arith.constant 0 : i32
    %c0_i32_1 = arith.constant 0 : i32
    return %c0_i32, %arg0, %c0_i32_0 : i32, i32, i32
  }
  func.func @transform_4(%arg0: i32) -> (i32, i32, i32) {
    %c0_i32 = arith.constant 0 : i32
    %c0_i32_0 = arith.constant 0 : i32
    %c0_i32_1 = arith.constant 0 : i32
    return %c0_i32, %arg0, %c0_i32_0 : i32, i32, i32
  }
}

</mosaic_0001>

<bundles_post_ra>
// kernel: up_bn2d.1
= control target key start
LH: loop header
LB: loop body
LE: loop exit
PB: predicated region body
PF: predicated region fallthrough
CT: control target
= control target key end

     0   :  { %vm25_vm0 = vcmask 1043456   ;;  %v1039_v10 = vmov 839922192   ;;  %v44_v12 = vlaneseq  ;;  %v1040_v35 = vmov 0   ;;  %s2907_s3 = inlined_call_operand.vmem [shape: f32[2,4,256], index: 3, kind: input, shape index: {}]   ;;  %s2908_s2 = inlined_call_operand.vmem [shape: f32[256,1024], index: 2, kind: input, shape index: {}]   ;;  %s2909_s0 = inlined_call_operand.vmem [shape: f32[1,4,1], index: 0, kind: input, shape index: {}]   ;;  %s2910_s1 = inlined_call_operand.vmem [shape: f32[1,4,1], index: 1, kind: input, shape index: {}]   ;;  %s2911_s4 = inlined_call_operand.vmem [shape: f32[2,4,1024], index: 4, kind: output, shape index: {}]  }
   0x1   :  { %v1069_v0 = vld [vmem:[%s2907_s3] sm:$0xff]  ;;  %v1074_v1 = vld [vmem:[%s2907_s3 + $0x8] sm:$0xff]  ;;  %v42_v11 = vunpack.c.l.s4 %v1039_v10  ;;  %989 = vset.pattern.permute.xlu0 %v1040_v35  ;;  %990 = vset.pattern.permute.xlu1 %v1040_v35  ;;  %v231_v37 = vld [vmem:[%s2908_s2 + $0x3d8] sm:$0xff] }
   0x2   :  { %v21_v2 = vcombine.high %v1069_v0, %v1069_v0  ;;  %v26_v3 = vsel %vm25_vm0, %v1069_v0, 0.0  ;;  %v22_v4 = vcombine.high %v1074_v1, %v1074_v1  ;;  %v31_v6 = vsel %vm25_vm0, %v1074_v1, 0.0  ;;  %v229_v36 = vld [vmem:[%s2908_s2 + $0x3c8] sm:$0xff]  ;;  %v228_v38 = vld [vmem:[%s2908_s2 + $0x3c0] sm:$0xff]  ;;  %438 = vmatprep.subr.mxu1 %v231_v37  ;;  %v230_v39 = vld [vmem:[%s2908_s2 + $0x3d0] sm:$0xff] }
   0x3   :  { %v43_v14 = vunpack.c.0.s8 %v42_v11  ;;  %v45_v15 = vshrl.u32 %v44_v12, 7  ;;  %367 = vmatprep.subr.mxu0 %v229_v36  ;;  %v221_v40 = vld [vmem:[%s2908_s2 + $0x388] sm:$0xff]  ;;  %v223_v41 = vld [vmem:[%s2908_s2 + $0x398] sm:$0xff]  ;;  %439 = vmatpush1.msra.mxu1 %v230_v39  ;;  %v220_v42 = vld [vmem:[%s2908_s2 + $0x380] sm:$0xff] }
   0x4   :  { %v27_v5 = vsel %vm25_vm0, %v21_v2, 0.0  ;;  %v32_v7 = vsel %vm25_vm0, %v22_v4, 0.0  ;;  %368 = vmatpush1.msra.mxu0 %v228_v38  ;;  %v222_v43 = vld [vmem:[%s2908_s2 + $0x390] sm:$0xff]  ;;  %v213_v44 = vld [vmem:[%s2908_s2 + $0x348] sm:$0xff]  ;;  %440 = vmatprep.subr.mxu1 %v223_v41  ;;  %v215_v45 = vld [vmem:[%s2908_s2 + $0x358] sm:$0xff] }
   0x5   :  { %v28_v8 = vadd.f32 %v27_v5, %v26_v3  ;;  %v33_v9 = vadd.f32 %v32_v7, %v31_v6  ;;  %v1088_v19 = vsub.s32 %v43_v14, %v45_v15  ;;  %369 = vmatprep.subr.mxu0 %v221_v40  ;;  %v212_v46 = vld [vmem:[%s2908_s2 + $0x340] sm:$0xff]  ;;  %v214_v47 = vld [vmem:[%s2908_s2 + $0x350] sm:$0xff]  ;;  %441 = vmatpush1.msra.mxu1 %v222_v43  ;;  %v205_v48 = vld [vmem:[%s2908_s2 + $0x308] sm:$0xff] }
   0x6   :  { %370 = vmatpush1.msra.mxu0 %v220_v42  ;;  %v207_v49 = vld [vmem:[%s2908_s2 + $0x318] sm:$0xff]  ;;  %442 = vmatprep.subr.mxu1 %v215_v45  ;;  %v204_v50 = vld [vmem:[%s2908_s2 + $0x300] sm:$0xff]  ;;  %v206_v51 = vld [vmem:[%s2908_s2 + $0x310] sm:$0xff] }
   0x7   :  { %29 = vadd.xlane.f32.xlu0 %v28_v8  ;;  %371 = vmatprep.subr.mxu0 %v213_v44  ;;  %v197_v52 = vld [vmem:[%s2908_s2 + $0x2c8] sm:$0xff]  ;;  %v199_v53 = vld [vmem:[%s2908_s2 + $0x2d8] sm:$0xff]  ;;  %v196_v54 = vld [vmem:[%s2908_s2 + $0x2c0] sm:$0xff] }
   0x8   :  { %372 = vmatpush1.msra.mxu0 %v212_v46  ;;  %443 = vmatpush1.msra.mxu1 %v214_v47  ;;  %v198_v55 = vld [vmem:[%s2908_s2 + $0x2d0] sm:$0xff]  ;;  %v189_v56 = vld [vmem:[%s2908_s2 + $0x288] sm:$0xff]  ;;  %v191_v57 = vld [vmem:[%s2908_s2 + $0x298] sm:$0xff] }
   0x9   :  { %373 = vmatprep.subr.mxu0 %v205_v48  ;;  %444 = vmatprep.subr.mxu1 %v207_v49  ;;  %v188_v58 = vld [vmem:[%s2908_s2 + $0x280] sm:$0xff]  ;;  %v190_v59 = vld [vmem:[%s2908_s2 + $0x290] sm:$0xff]  ;;  %v181_v60 = vld [vmem:[%s2908_s2 + $0x248] sm:$0xff] }
   0xa   :  { %374 = vmatpush1.msra.mxu0 %v204_v50  ;;  %445 = vmatpush1.msra.mxu1 %v206_v51  ;;  %v183_v61 = vld [vmem:[%s2908_s2 + $0x258] sm:$0xff]  ;;  %v180_v62 = vld [vmem:[%s2908_s2 + $0x240] sm:$0xff]  ;;  %v182_v63 = vld [vmem:[%s2908_s2 + $0x250] sm:$0xff] }
   0xb   :  { %34 = vadd.xlane.f32.xlu0 %v33_v9  ;;  %375 = vmatprep.subr.mxu0 %v197_v52  ;;  %v173_v2 = vld [vmem:[%s2908_s2 + $0x208] sm:$0xff]  ;;  %v175_v3 = vld [vmem:[%s2908_s2 + $0x218] sm:$0xff]  ;;  %v172_v4 = vld [vmem:[%s2908_s2 + $0x200] sm:$0xff] }
   0xc   :  { %446 = vmatprep.subr.mxu1 %v199_v53  ;;  %376 = vmatpush1.msra.mxu0 %v196_v54  ;;  %v174_v5 = vld [vmem:[%s2908_s2 + $0x210] sm:$0xff]  ;;  %v165_v6 = vld [vmem:[%s2908_s2 + $0x1c8] sm:$0xff]  ;;  %v167_v7 = vld [vmem:[%s2908_s2 + $0x1d8] sm:$0xff] }
   0xd   :  { %447 = vmatpush1.msra.mxu1 %v198_v55  ;;  %377 = vmatprep.subr.mxu0 %v189_v56  ;;  %v164_v8 = vld [vmem:[%s2908_s2 + $0x1c0] sm:$0xff]  ;;  %v166_v9 = vld [vmem:[%s2908_s2 + $0x1d0] sm:$0xff]  ;;  %v157_v10 = vld [vmem:[%s2908_s2 + $0x188] sm:$0xff] }
   0xe   :  { %448 = vmatprep.subr.mxu1 %v191_v57  ;;  %378 = vmatpush1.msra.mxu0 %v188_v58  ;;  %v159_v11 = vld [vmem:[%s2908_s2 + $0x198] sm:$0xff]  ;;  %v156_v12 = vld [vmem:[%s2908_s2 + $0x180] sm:$0xff]  ;;  %v149_v14 = vld [vmem:[%s2908_s2 + $0x148] sm:$0xff] }
   0xf   :  { %449 = vmatpush1.msra.mxu1 %v190_v59  ;;  %379 = vmatprep.subr.mxu0 %v181_v60  ;;  %v151_v15 = vld [vmem:[%s2908_s2 + $0x158] sm:$0xff]  ;;  %v1320_v35 = vld [vmem:[%s2908_s2 + $0x50] sm:$0xff]  ;;  %v1327_v36 = vld [vmem:[%s2908_s2 + $0x8] sm:$0xff] }
  0x10   :  { %450 = vmatprep.subr.mxu1 %v183_v61  ;;  %380 = vmatpush1.msra.mxu0 %v180_v62  ;;  %v1332_v37 = vld [vmem:[%s2908_s2 + $0x18] sm:$0xff]  ;;  %v1339_v38 = vld [vmem:[%s2908_s2] sm:$0xff]  ;;  %v1344_v39 = vld [vmem:[%s2908_s2 + $0x10] sm:$0xff] }
  0x11   :  { %451 = vmatpush1.msra.mxu1 %v182_v63  ;;  %381 = vmatprep.subr.mxu0 %v173_v2  ;;  %v1351_v40 = vld [vmem:[%s2908_s2 + $0x7c8] sm:$0xff]  ;;  %v1356_v41 = vld [vmem:[%s2908_s2 + $0x7d8] sm:$0xff]  ;;  %v1363_v42 = vld [vmem:[%s2908_s2 + $0x7c0] sm:$0xff] }
  0x12   :  { %452 = vmatprep.subr.mxu1 %v175_v3  ;;  %382 = vmatpush1.msra.mxu0 %v172_v4  ;;  %v1368_v43 = vld [vmem:[%s2908_s2 + $0x7d0] sm:$0xff]  ;;  %v1375_v44 = vld [vmem:[%s2908_s2 + $0x788] sm:$0xff]  ;;  %v1380_v45 = vld [vmem:[%s2908_s2 + $0x798] sm:$0xff] }
  0x13   :  { %453 = vmatpush1.msra.mxu1 %v174_v5  ;;  %383 = vmatprep.subr.mxu0 %v165_v6  ;;  %v1387_v46 = vld [vmem:[%s2908_s2 + $0x780] sm:$0xff]  ;;  %v1392_v47 = vld [vmem:[%s2908_s2 + $0x790] sm:$0xff]  ;;  %v1399_v48 = vld [vmem:[%s2908_s2 + $0x748] sm:$0xff] }
  0x14   :  { %454 = vmatprep.subr.mxu1 %v167_v7  ;;  %384 = vmatpush1.msra.mxu0 %v164_v8  ;;  %v1404_v49 = vld [vmem:[%s2908_s2 + $0x758] sm:$0xff]  ;;  %v1411_v50 = vld [vmem:[%s2908_s2 + $0x740] sm:$0xff]  ;;  %v1416_v51 = vld [vmem:[%s2908_s2 + $0x750] sm:$0xff] }
  0x15   :  { %455 = vmatpush1.msra.mxu1 %v166_v9  ;;  %385 = vmatprep.subr.mxu0 %v157_v10  ;;  %v1423_v52 = vld [vmem:[%s2908_s2 + $0x708] sm:$0xff]  ;;  %v1428_v53 = vld [vmem:[%s2908_s2 + $0x718] sm:$0xff]  ;;  %v1435_v54 = vld [vmem:[%s2908_s2 + $0x700] sm:$0xff] }
  0x16   :  { %456 = vmatprep.subr.mxu1 %v159_v11  ;;  %386 = vmatpush1.msra.mxu0 %v156_v12  ;;  %v1440_v55 = vld [vmem:[%s2908_s2 + $0x710] sm:$0xff]  ;;  %v1447_v56 = vld [vmem:[%s2908_s2 + $0x6c8] sm:$0xff]  ;;  %v1452_v57 = vld [vmem:[%s2908_s2 + $0x6d8] sm:$0xff] }
  0x17   :  { %387 = vmatprep.subr.mxu0 %v149_v14  ;;  %v1459_v58 = vld [vmem:[%s2908_s2 + $0x6c0] sm:$0xff]  ;;  %v1464_v59 = vld [vmem:[%s2908_s2 + $0x6d0] sm:$0xff]  ;;  %v1471_v60 = vld [vmem:[%s2908_s2 + $0x688] sm:$0xff] }
  0x18   :  { %v1476_v61 = vld [vmem:[%s2908_s2 + $0x698] sm:$0xff]  ;;  %v1483_v62 = vld [vmem:[%s2908_s2 + $0x680] sm:$0xff]  ;;  %v1488_v63 = vld [vmem:[%s2908_s2 + $0x690] sm:$0xff] }
  0x19   :  { %v1495_v2 = vld [vmem:[%s2908_s2 + $0x648] sm:$0xff]  ;;  %v1500_v3 = vld [vmem:[%s2908_s2 + $0x658] sm:$0xff]  ;;  %v1507_v4 = vld [vmem:[%s2908_s2 + $0x640] sm:$0xff] }
  0x1a   :  { %v1512_v5 = vld [vmem:[%s2908_s2 + $0x650] sm:$0xff]  ;;  %v1519_v6 = vld [vmem:[%s2908_s2 + $0x608] sm:$0xff]  ;;  %v1524_v7 = vld [vmem:[%s2908_s2 + $0x618] sm:$0xff] }
  0x1b   :  { %3067 = vst [vmem:[#allocation2_spill] sm:$0xff] %v1512_v5  ;;  %3068 = vst [vmem:[#allocation3_spill] sm:$0xff] %v1519_v6  ;;  %v1531_v8 = vld [vmem:[%s2908_s2 + $0x600] sm:$0xff]  ;;  %v1536_v9 = vld [vmem:[%s2908_s2 + $0x610] sm:$0xff] }
  0x1c   :  { %3069 = vst [vmem:[#allocation4_spill] sm:$0xff] %v1524_v7  ;;  %3070 = vst [vmem:[#allocation5_spill] sm:$0xff] %v1531_v8  ;;  %v1543_v10 = vld [vmem:[%s2908_s2 + $0x5c8] sm:$0xff]  ;;  %v1548_v11 = vld [vmem:[%s2908_s2 + $0x5d8] sm:$0xff] }
  0x1d   :  { %3071 = vst [vmem:[#allocation6_spill] sm:$0xff] %v1536_v9  ;;  %3072 = vst [vmem:[#allocation7_spill] sm:$0xff] %v1543_v10  ;;  %v1555_v12 = vld [vmem:[%s2908_s2 + $0x5c0] sm:$0xff]  ;;  %v1567_v14 = vld [vmem:[%s2908_s2 + $0x588] sm:$0xff] }
  0x1e   :  { %3073 = vst [vmem:[#allocation8_spill] sm:$0xff] %v1548_v11  ;;  %3074 = vst [vmem:[#allocation9_spill] sm:$0xff] %v1555_v12 }
  0x1f   :  { %3076 = vst [vmem:[#allocation11_spill] sm:$0xff] %v1567_v14 }
  0x90   :  { %v30_v13 = vpop.xlane.xlu0 %29 }
  0x91   :  { %v36_v17 = vsel %vm25_vm0, %v30_v13, 0.0  ;;  %v158_v13 = vld [vmem:[%s2908_s2 + $0x190] sm:$0xff] }
  0x92   :  { %457 = vmatpush1.msra.mxu1 %v158_v13  ;;  %v1560_v13 = vld [vmem:[%s2908_s2 + $0x5d0] sm:$0xff] }
  0x93   :  { %458 = vmatprep.subr.mxu1 %v151_v15  ;;  %3075 = vst [vmem:[#allocation10_spill] sm:$0xff] %v1560_v13  ;;  %v1572_v15 = vld [vmem:[%s2908_s2 + $0x598] sm:$0xff] }
  0x94   :  { %v35_v16 = vpop.xlane.xlu0 %34  ;;  %3077 = vst [vmem:[#allocation12_spill] sm:$0xff] %v1572_v15 }
  0x95   :  { %v37_v18 = vsel %vm25_vm0, %v35_v16, 0.0  ;;  %v148_v16 = vld [vmem:[%s2908_s2 + $0x140] sm:$0xff] }
  0x96   :  { %v38_v20 = vadd.f32 %v37_v18, %v36_v17  ;;  %v150_v17 = vld [vmem:[%s2908_s2 + $0x150] sm:$0xff]  ;;  %v1235_v18 = vld [vmem:[%s2908_s2 + $0x108] sm:$0xff]  ;;  %388 = vmatpush1.msra.mxu0 %v148_v16  ;;  %v1579_v16 = vld [vmem:[%s2908_s2 + $0x580] sm:$0xff] }
  0x97   :  { %459 = vmatpush1.msra.mxu1 %v150_v17  ;;  %389 = vmatprep.subr.mxu0 %v1235_v18  ;;  %v1584_v17 = vld [vmem:[%s2908_s2 + $0x590] sm:$0xff] }
  0x98   :  { %v1090_v21 = vmul.f32 0.001953125, %v38_v20  ;;  %v1240_v20 = vld [vmem:[%s2908_s2 + $0x118] sm:$0xff] }
  0x99   :  { %460 = vmatprep.subr.mxu1 %v1240_v20 }
  0x9a   :  { %v47_v22 = vrot.slane %v1090_v21, %v1088_v19 }
  0x9c   :  { %v49_v23 = vsub.f32 %v1069_v0, %v47_v22  ;;  %v50_v24 = vsub.f32 %v1074_v1, %v47_v22  ;;  %v1245_v22 = vld [vmem:[%s2908_s2 + $0x100] sm:$0xff] }
  0x9d   :  { %390 = vmatpush1.msra.mxu0 %v1245_v22 }
  0x9e   :  { %v51_v25 = vmul.f32 %v49_v23, %v49_v23  ;;  %v52_v26 = vmul.f32 %v50_v24, %v50_v24  ;;  %v1250_v23 = vld [vmem:[%s2908_s2 + $0x110] sm:$0xff]  ;;  %v1255_v24 = vld [vmem:[%s2908_s2 + $0xc8] sm:$0xff] }
  0x9f   :  { %461 = vmatpush1.msra.mxu1 %v1250_v23  ;;  %391 = vmatprep.subr.mxu0 %v1255_v24 }
  0xa0   :  { %v55_v27 = vcombine.high %v51_v25, %v51_v25  ;;  %v56_v28 = vcombine.high %v52_v26, %v52_v26  ;;  %v59_v29 = vsel %vm25_vm0, %v51_v25, 0.0  ;;  %v64_v33 = vsel %vm25_vm0, %v52_v26, 0.0  ;;  %v1260_v25 = vld [vmem:[%s2908_s2 + $0xd8] sm:$0xff]  ;;  %v1267_v26 = vld [vmem:[%s2908_s2 + $0xc0] sm:$0xff] }
  0xa1   :  { %462 = vmatprep.subr.mxu1 %v1260_v25  ;;  %392 = vmatpush1.msra.mxu0 %v1267_v26 }
  0xa2   :  { %v60_v30 = vsel %vm25_vm0, %v55_v27, 0.0  ;;  %v65_v32 = vsel %vm25_vm0, %v56_v28, 0.0  ;;  %v1272_v27 = vld [vmem:[%s2908_s2 + $0xd0] sm:$0xff]  ;;  %v1279_v28 = vld [vmem:[%s2908_s2 + $0x88] sm:$0xff] }
  0xa3   :  { %v61_v31 = vadd.f32 %v60_v30, %v59_v29  ;;  %v66_v34 = vadd.f32 %v65_v32, %v64_v33  ;;  %v1284_v29 = vld [vmem:[%s2908_s2 + $0x98] sm:$0xff]  ;;  %v1291_v30 = vld [vmem:[%s2908_s2 + $0x80] sm:$0xff]  ;;  %463 = vmatpush1.msra.mxu1 %v1272_v27  ;;  %v1303_v32 = vld [vmem:[%s2908_s2 + $0x48] sm:$0xff]  ;;  %393 = vmatprep.subr.mxu0 %v1279_v28 }
  0xa4   :  { %v1308_v33 = vld [vmem:[%s2908_s2 + $0x58] sm:$0xff]  ;;  %464 = vmatprep.subr.mxu1 %v1284_v29  ;;  %394 = vmatpush1.msra.mxu0 %v1291_v30 }
  0xa5   :  { %62 = vadd.xlane.f32.xlu1 %v61_v31  ;;  %v1296_v31 = vld [vmem:[%s2908_s2 + $0x90] sm:$0xff]  ;;  %395 = vmatprep.subr.mxu0 %v1303_v32 }
  0xa6   :  { %465 = vmatpush1.msra.mxu1 %v1296_v31 }
  0xa7   :  { %466 = vmatprep.subr.mxu1 %v1308_v33 }
  0xa8   :  { %467 = vmatpush1.msra.mxu1 %v1320_v35 }
  0xa9   :  { %67 = vadd.xlane.f32.xlu1 %v66_v34  ;;  %v1315_v34 = vld [vmem:[%s2908_s2 + $0x40] sm:$0xff]  ;;  %468 = vmatprep.subr.mxu1 %v1332_v37 }
  0xaa   :  { %396 = vmatpush1.msra.mxu0 %v1315_v34  ;;  %469 = vmatpush1.msra.mxu1 %v1344_v39 }
  0xab   :  { %397 = vmatprep.subr.mxu0 %v1327_v36  ;;  %470 = vmatprep.subr.mxu1 %v1356_v41 }
  0xac   :  { %398 = vmatpush1.msra.mxu0 %v1339_v38  ;;  %471 = vmatpush2.msra.mxu1 %v1368_v43 }
  0xad   :  { %399 = vmatprep.subr.mxu0 %v1351_v40  ;;  %472 = vmatprep.subr.mxu1 %v1380_v45 }
  0xae   :  { %400 = vmatpush2.msra.mxu0 %v1363_v42  ;;  %473 = vmatpush2.msra.mxu1 %v1392_v47 }
  0xaf   :  { %401 = vmatprep.subr.mxu0 %v1375_v44  ;;  %474 = vmatprep.subr.mxu1 %v1404_v49 }
  0xb0   :  { %402 = vmatpush2.msra.mxu0 %v1387_v46  ;;  %475 = vmatpush2.msra.mxu1 %v1416_v51 }
  0xb1   :  { %403 = vmatprep.subr.mxu0 %v1399_v48  ;;  %476 = vmatprep.subr.mxu1 %v1428_v53 }
  0xb2   :  { %404 = vmatpush2.msra.mxu0 %v1411_v50  ;;  %477 = vmatpush2.msra.mxu1 %v1440_v55 }
  0xb3   :  { %405 = vmatprep.subr.mxu0 %v1423_v52  ;;  %478 = vmatprep.subr.mxu1 %v1452_v57 }
  0xb4   :  { %406 = vmatpush2.msra.mxu0 %v1435_v54  ;;  %479 = vmatpush2.msra.mxu1 %v1464_v59 }
  0xb5   :  { %407 = vmatprep.subr.mxu0 %v1447_v56  ;;  %480 = vmatprep.subr.mxu1 %v1476_v61 }
  0xb6   :  { %408 = vmatpush2.msra.mxu0 %v1459_v58  ;;  %481 = vmatpush2.msra.mxu1 %v1488_v63 }
  0xb7   :  { %409 = vmatprep.subr.mxu0 %v1471_v60  ;;  %482 = vmatprep.subr.mxu1 %v1500_v3 }
  0xb8   :  { %410 = vmatpush2.msra.mxu0 %v1483_v62  ;;  %483 = vmatpush2.msra.mxu1 %v1512_v5 }
  0xb9   :  { %411 = vmatprep.subr.mxu0 %v1495_v2  ;;  %484 = vmatprep.subr.mxu1 %v1524_v7 }
  0xba   :  { %412 = vmatpush2.msra.mxu0 %v1507_v4  ;;  %485 = vmatpush2.msra.mxu1 %v1536_v9 }
  0xbb   :  { %413 = vmatprep.subr.mxu0 %v1519_v6  ;;  %486 = vmatprep.subr.mxu1 %v1548_v11  ;;  %v1596_v11 = vld [vmem:[%s2908_s2 + $0x558] sm:$0xff] }
  0xbc   :  { %414 = vmatpush2.msra.mxu0 %v1531_v8  ;;  %487 = vmatpush2.msra.mxu1 %v1560_v13  ;;  %3079 = vst [vmem:[#allocation14_spill] sm:$0xff] %v1596_v11  ;;  %v1608_v13 = vld [vmem:[%s2908_s2 + $0x550] sm:$0xff] }
  0xbd   :  { %415 = vmatprep.subr.mxu0 %v1543_v10  ;;  %v1591_v10 = vld [vmem:[%s2908_s2 + $0x548] sm:$0xff]  ;;  %488 = vmatprep.subr.mxu1 %v1572_v15  ;;  %3081 = vst [vmem:[#allocation16_spill] sm:$0xff] %v1608_v13 }
  0xbe   :  { %416 = vmatpush2.msra.mxu0 %v1555_v12  ;;  %3078 = vst [vmem:[#allocation13_spill] sm:$0xff] %v1591_v10  ;;  %v1603_v12 = vld [vmem:[%s2908_s2 + $0x540] sm:$0xff]  ;;  %489 = vmatpush2.msra.mxu1 %v1584_v17 }
  0xbf   :  { %417 = vmatprep.subr.mxu0 %v1567_v14  ;;  %3080 = vst [vmem:[#allocation15_spill] sm:$0xff] %v1603_v12  ;;  %490 = vmatprep.subr.mxu1 %v1596_v11 }
  0xc0   :  { %418 = vmatpush2.msra.mxu0 %v1579_v16  ;;  %491 = vmatpush2.msra.mxu1 %v1608_v13  ;;  %v1629_v13 = vld [vmem:[%s2908_s2 + $0x518] sm:$0xff] }
  0xc1   :  { %419 = vmatprep.subr.mxu0 %v1591_v10  ;;  %v75_v10 = vld [vmem:[%s2909_s0] sm:$0xf]  ;;  %3083 = vst [vmem:[#allocation18_spill] sm:$0xff] %v1629_v13  ;;  %492 = vmatprep.subr.mxu1 %v1629_v13 }
  0xc2   :  { %420 = vmatpush2.msra.mxu0 %v1603_v12  ;;  %v1624_v12 = vld [vmem:[%s2908_s2 + $0x508] sm:$0xff] }
  0xc3   :  { %3082 = vst [vmem:[#allocation17_spill] sm:$0xff] %v1624_v12  ;;  %421 = vmatprep.subr.mxu0 %v1624_v12 }
 0x12e   :  { %v63_v15 = vpop.xlane.xlu1 %62 }
 0x12f   :  { %v69_v9 = vsel %vm25_vm0, %v63_v15, 0.0  ;;  %v1660_v15 = vld [vmem:[%s2908_s2 + $0x4c0] sm:$0xff] }
 0x130   :  { %3088 = vst [vmem:[#allocation23_spill] sm:$0xff] %v1660_v15 }
 0x132   :  { %v68_v14 = vpop.xlane.xlu1 %67 }
 0x133   :  { %v70_v8 = vsel %vm25_vm0, %v68_v14, 0.0 }
 0x134   :  { %v71_v7 = vadd.f32 %v70_v8, %v69_v9  ;;  %v1648_v8 = vld [vmem:[%s2908_s2 + $0x4c8] sm:$0xff]  ;;  %v1653_v9 = vld [vmem:[%s2908_s2 + $0x4d8] sm:$0xff] }
 0x135   :  { %3086 = vst [vmem:[#allocation21_spill] sm:$0xff] %v1648_v8  ;;  %3087 = vst [vmem:[#allocation22_spill] sm:$0xff] %v1653_v9 }
 0x136   :  { %v72_v6 = vmul.f32 0.001953125, %v71_v7 }
 0x138   :  { %v73_v5 = vadd.f32 1e-05, %v72_v6  ;;  %v1641_v6 = vld [vmem:[%s2908_s2 + $0x510] sm:$0xff] }
 0x139   :  { %3085 = vst [vmem:[#allocation20_spill] sm:$0xff] %v1641_v6  ;;  %493 = vmatpush2.msra.mxu1 %v1641_v6  ;;  %v1665_v6 = vld [vmem:[%s2908_s2 + $0x4d0] sm:$0xff] }
 0x13a   :  { %993 = vrsqrt.f32 %v73_v5  ;;  %v1636_v5 = vld [vmem:[%s2908_s2 + $0x500] sm:$0xff]  ;;  %494 = vmatprep.subr.mxu1 %v1653_v9  ;;  %3089 = vst [vmem:[#allocation24_spill] sm:$0xff] %v1665_v6 }
 0x13b   :  { %3084 = vst [vmem:[#allocation19_spill] sm:$0xff] %v1636_v5  ;;  %422 = vmatpush2.msra.mxu0 %v1636_v5  ;;  %v77_v5 = vld [vmem:[%s2910_s1] sm:$0xf]  ;;  %495 = vmatpush2.msra.mxu1 %v1665_v6  ;;  %v1692_v6 = vld [vmem:[%s2908_s2 + $0x490] sm:$0xff] }
 0x13c   :  { %423 = vmatprep.subr.mxu0 %v1648_v8  ;;  %3093 = vst [vmem:[#allocation28_spill] sm:$0xff] %v1692_v6  ;;  %v1721_v8 = vld [vmem:[%s2908_s2 + $0x408] sm:$0xff] }
 0x13d   :  { %424 = vmatpush2.msra.mxu0 %v1660_v15  ;;  %v1687_v15 = vld [vmem:[%s2908_s2 + $0x480] sm:$0xff]  ;;  %3098 = vst [vmem:[#allocation33_spill] sm:$0xff] %v1721_v8 }
 0x13e   :  { %3092 = vst [vmem:[#allocation27_spill] sm:$0xff] %v1687_v15 }
 0x147   :  { %v994_v7 = vpop.eup %993 }
 0x148   :  { %v76_v14 = vmul.f32 %v994_v7, %v75_v10  ;;  %v1675_v10 = vld [vmem:[%s2908_s2 + $0x488] sm:$0xff]  ;;  %v1680_v7 = vld [vmem:[%s2908_s2 + $0x498] sm:$0xff] }
 0x149   :  { %3090 = vst [vmem:[#allocation25_spill] sm:$0xff] %v1675_v10  ;;  %3091 = vst [vmem:[#allocation26_spill] sm:$0xff] %v1680_v7  ;;  %425 = vmatprep.subr.mxu0 %v1675_v10  ;;  %496 = vmatprep.subr.mxu1 %v1680_v7  ;;  %v1711_v7 = vld [vmem:[%s2908_s2 + $0x440] sm:$0xff] }
 0x14a   :  { %82 = vperm.xlu0 %989, %v76_v14   ;;  %v78_v9 = vmul.f32 %v76_v14, %v1090_v21  ;;  %426 = vmatpush2.msra.mxu0 %v1687_v15  ;;  %v1699_v21 = vld [vmem:[%s2908_s2 + $0x448] sm:$0xff]  ;;  %v1704_v14 = vld [vmem:[%s2908_s2 + $0x458] sm:$0xff]  ;;  %3096 = vst [vmem:[#allocation31_spill] sm:$0xff] %v1711_v7  ;;  %v1716_v15 = vld [vmem:[%s2908_s2 + $0x450] sm:$0xff] }
 0x14b   :  { %3094 = vst [vmem:[#allocation29_spill] sm:$0xff] %v1699_v21  ;;  %3095 = vst [vmem:[#allocation30_spill] sm:$0xff] %v1704_v14  ;;  %497 = vmatpush2.msra.mxu1 %v1692_v6  ;;  %427 = vmatprep.subr.mxu0 %v1699_v21  ;;  %v1738_v21 = vld [vmem:[%s2908_s2 + $0x410] sm:$0xff] }
 0x14c   :  { %v79_v10 = vsub.f32 %v77_v5, %v78_v9  ;;  %3097 = vst [vmem:[#allocation32_spill] sm:$0xff] %v1716_v15  ;;  %498 = vmatprep.subr.mxu1 %v1704_v14  ;;  %428 = vmatpush2.msra.mxu0 %v1711_v7  ;;  %v1728_v5 = vld [vmem:[%s2908_s2 + $0x418] sm:$0xff]  ;;  %v1733_v9 = vld [vmem:[%s2908_s2 + $0x400] sm:$0xff]  ;;  %3100 = vst [vmem:[#allocation35_spill] sm:$0xff] %v1738_v21 }
 0x14d   :  { %3099 = vst [vmem:[#allocation34_spill] sm:$0xff] %v1728_v5  ;;  %499 = vmatpush2.msra.mxu1 %v1716_v15  ;;  %429 = vmatprep.subr.mxu0 %v1721_v8  ;;  %v1746_v7 = vld [vmem:[%s2908_s2 + $0x3e8] sm:$0xff]  ;;  %v1751_v14 = vld [vmem:[%s2908_s2 + $0x3f8] sm:$0xff] }
 0x14e   :  { %96 = vperm.xlu1 %990, %v79_v10   ;;  %500 = vmatprep.subr.mxu1 %v1728_v5  ;;  %3101 = vst [vmem:[#allocation36_spill] sm:$0xff] %v1751_v14 }
 0x14f   :  { %430 = vmatpush2.msra.mxu0 %v1733_v9  ;;  %501 = vmatpush2.msra.mxu1 %v1738_v21 }
 0x150   :  { %509 = vmatprep.subr.mxu0 %v1746_v7  ;;  %580 = vmatprep.subr.mxu1 %v1751_v14  ;;  %v1770_v14 = vld [vmem:[%s2908_s2 + $0x3e0] sm:$0xff] }
 0x1c5   :  { %v83_v10 = vpop.permute.xlu0 %82 }
 0x1c6   :  { %v90_v5 = vrot.slane %v83_v10, %v1088_v19  ;;  %v1821_v10 = vld [vmem:[%s2908_s2 + $0x370] sm:$0xff] }
 0x1c7   :  { %3108 = vst [vmem:[#allocation43_spill] sm:$0xff] %v1821_v10 }
 0x1c8   :  { %v92_v15 = vmul.f32 %v90_v5, %v1069_v0  ;;  %v93_v6 = vmul.f32 %v90_v5, %v1074_v1  ;;  %v1775_v0 = vld [vmem:[%s2908_s2 + $0x3f0] sm:$0xff]  ;;  %v1780_v1 = vld [vmem:[%s2908_s2 + $0x3a8] sm:$0xff]  ;;  %v1816_v5 = vld [vmem:[%s2908_s2 + $0x360] sm:$0xff] }
 0x1c9   :  { %v97_v8 = vpop.permute.xlu1 %96  ;;  %3102 = vst [vmem:[#allocation37_spill] sm:$0xff] %v1780_v1  ;;  %3107 = vst [vmem:[#allocation42_spill] sm:$0xff] %v1816_v5 }
 0x1ca   :  { %v104_v13 = vrot.slane %v97_v8, %v1088_v19  ;;  %v1787_v19 = vld [vmem:[%s2908_s2 + $0x3b8] sm:$0xff]  ;;  %v1805_v8 = vld [vmem:[%s2908_s2 + $0x368] sm:$0xff] }
 0x1cb   :  { %3105 = vst [vmem:[#allocation40_spill] sm:$0xff] %v1805_v8 }
 0x1cc   :  { %v1761_v12 = vadd.f32 %v104_v13, %v92_v15  ;;  %v1763_v11 = vadd.f32 %v104_v13, %v93_v6  ;;  %v1794_v13 = vld [vmem:[%s2908_s2 + $0x3a0] sm:$0xff]  ;;  %v1799_v6 = vld [vmem:[%s2908_s2 + $0x3b0] sm:$0xff]  ;;  %v1810_v15 = vld [vmem:[%s2908_s2 + $0x378] sm:$0xff] }
 0x1cd   :  { %3103 = vst [vmem:[#allocation38_spill] sm:$0xff] %v1794_v13  ;;  %3104 = vst [vmem:[#allocation39_spill] sm:$0xff] %v1799_v6 }
 0x1ce   :  { %v365_v21 = vcombine.high %v1761_v12, %v1761_v12  ;;  %3106 = vst [vmem:[#allocation41_spill] sm:$0xff] %v1810_v15 }
 0x1d0   :  { %431 = vmatprep.mubr.f32.mxu0 %v365_v21  ;;  %502 = vmatprep.mubr.f32.mxu1 %v365_v21 }
 0x1d1   :  { %432 = vmatmul.mubr.f32.vlgmr.msra.gmra.mxu0 %v1761_v12  ;;  %503 = vmatmul.mubr.f32.vlgmr.msra.gmra.mxu1 %v1761_v12 }
 0x1d2   :  { %510 = vmatpush1.msra.mxu0 %v1770_v14  ;;  %581 = vmatpush1.msra.mxu1 %v1775_v0 }
 0x1d3   :  { %511 = vmatprep.subr.mxu0 %v1780_v1  ;;  %573 = vmatprep.mubr.f32.mxu0 %v365_v21  ;;  %v1828_v1 = vld [vmem:[%s2908_s2 + $0x328] sm:$0xff] }
 0x1d4   :  { %582 = vmatprep.subr.mxu1 %v1787_v19  ;;  %644 = vmatprep.mubr.f32.mxu1 %v365_v21  ;;  %3109 = vst [vmem:[#allocation44_spill] sm:$0xff] %v1828_v1  ;;  %v1833_v21 = vld [vmem:[%s2908_s2 + $0x338] sm:$0xff] }
 0x1d5   :  { %512 = vmatpush1.msra.mxu0 %v1794_v13  ;;  %583 = vmatpush1.msra.mxu1 %v1799_v6  ;;  %3110 = vst [vmem:[#allocation45_spill] sm:$0xff] %v1833_v21  ;;  %v1840_v13 = vld [vmem:[%s2908_s2 + $0x320] sm:$0xff]  ;;  %v1845_v6 = vld [vmem:[%s2908_s2 + $0x330] sm:$0xff] }
 0x1d6   :  { %513 = vmatprep.subr.mxu0 %v1805_v8  ;;  %584 = vmatprep.subr.mxu1 %v1810_v15  ;;  %3111 = vst [vmem:[#allocation46_spill] sm:$0xff] %v1840_v13  ;;  %3112 = vst [vmem:[#allocation47_spill] sm:$0xff] %v1845_v6  ;;  %v1852_v8 = vld [vmem:[%s2908_s2 + $0x2e8] sm:$0xff]  ;;  %v1857_v15 = vld [vmem:[%s2908_s2 + $0x2f8] sm:$0xff] }
 0x1d7   :  { %514 = vmatpush1.msra.mxu0 %v1816_v5  ;;  %585 = vmatpush1.msra.mxu1 %v1821_v10  ;;  %3113 = vst [vmem:[#allocation48_spill] sm:$0xff] %v1852_v8  ;;  %3114 = vst [vmem:[#allocation49_spill] sm:$0xff] %v1857_v15  ;;  %v1864_v5 = vld [vmem:[%s2908_s2 + $0x2e0] sm:$0xff]  ;;  %v1869_v10 = vld [vmem:[%s2908_s2 + $0x2f0] sm:$0xff] }
 0x1d8   :  { %515 = vmatprep.subr.mxu0 %v1828_v1  ;;  %586 = vmatprep.subr.mxu1 %v1833_v21  ;;  %3115 = vst [vmem:[#allocation50_spill] sm:$0xff] %v1864_v5  ;;  %3116 = vst [vmem:[#allocation51_spill] sm:$0xff] %v1869_v10  ;;  %v1876_v1 = vld [vmem:[%s2908_s2 + $0x2a8] sm:$0xff]  ;;  %v1881_v21 = vld [vmem:[%s2908_s2 + $0x2b8] sm:$0xff] }
 0x1d9   :  { %516 = vmatpush1.msra.mxu0 %v1840_v13  ;;  %587 = vmatpush1.msra.mxu1 %v1845_v6  ;;  %3117 = vst [vmem:[#allocation52_spill] sm:$0xff] %v1876_v1  ;;  %3118 = vst [vmem:[#allocation53_spill] sm:$0xff] %v1881_v21  ;;  %v1888_v13 = vld [vmem:[%s2908_s2 + $0x2a0] sm:$0xff]  ;;  %v1893_v6 = vld [vmem:[%s2908_s2 + $0x2b0] sm:$0xff] }
 0x1da   :  { %517 = vmatprep.subr.mxu0 %v1852_v8  ;;  %588 = vmatprep.subr.mxu1 %v1857_v15  ;;  %3119 = vst [vmem:[#allocation54_spill] sm:$0xff] %v1888_v13  ;;  %3120 = vst [vmem:[#allocation55_spill] sm:$0xff] %v1893_v6  ;;  %v1900_v8 = vld [vmem:[%s2908_s2 + $0x268] sm:$0xff]  ;;  %v1905_v15 = vld [vmem:[%s2908_s2 + $0x278] sm:$0xff] }
 0x1db   :  { %518 = vmatpush1.msra.mxu0 %v1864_v5  ;;  %589 = vmatpush1.msra.mxu1 %v1869_v10  ;;  %3121 = vst [vmem:[#allocation56_spill] sm:$0xff] %v1900_v8  ;;  %3122 = vst [vmem:[#allocation57_spill] sm:$0xff] %v1905_v15  ;;  %v1912_v5 = vld [vmem:[%s2908_s2 + $0x260] sm:$0xff]  ;;  %v1917_v10 = vld [vmem:[%s2908_s2 + $0x270] sm:$0xff] }
 0x1dc   :  { %519 = vmatprep.subr.mxu0 %v1876_v1  ;;  %590 = vmatprep.subr.mxu1 %v1881_v21  ;;  %3123 = vst [vmem:[#allocation58_spill] sm:$0xff] %v1912_v5  ;;  %3124 = vst [vmem:[#allocation59_spill] sm:$0xff] %v1917_v10  ;;  %v1924_v1 = vld [vmem:[%s2908_s2 + $0x228] sm:$0xff]  ;;  %v1929_v21 = vld [vmem:[%s2908_s2 + $0x238] sm:$0xff] }
 0x1dd   :  { %520 = vmatpush1.msra.mxu0 %v1888_v13  ;;  %591 = vmatpush1.msra.mxu1 %v1893_v6  ;;  %3125 = vst [vmem:[#allocation60_spill] sm:$0xff] %v1924_v1  ;;  %3126 = vst [vmem:[#allocation61_spill] sm:$0xff] %v1929_v21  ;;  %v1936_v13 = vld [vmem:[%s2908_s2 + $0x220] sm:$0xff]  ;;  %v1941_v6 = vld [vmem:[%s2908_s2 + $0x230] sm:$0xff] }
 0x1de   :  { %521 = vmatprep.subr.mxu0 %v1900_v8  ;;  %592 = vmatprep.subr.mxu1 %v1905_v15  ;;  %3127 = vst [vmem:[#allocation62_spill] sm:$0xff] %v1936_v13  ;;  %3128 = vst [vmem:[#allocation63_spill] sm:$0xff] %v1941_v6  ;;  %v1948_v8 = vld [vmem:[%s2908_s2 + $0x1e8] sm:$0xff]  ;;  %v1953_v15 = vld [vmem:[%s2908_s2 + $0x1f8] sm:$0xff] }
 0x1df   :  { %522 = vmatpush1.msra.mxu0 %v1912_v5  ;;  %593 = vmatpush1.msra.mxu1 %v1917_v10  ;;  %3129 = vst [vmem:[#allocation64_spill] sm:$0xff] %v1948_v8  ;;  %3130 = vst [vmem:[#allocation65_spill] sm:$0xff] %v1953_v15  ;;  %v1960_v5 = vld [vmem:[%s2908_s2 + $0x1e0] sm:$0xff]  ;;  %v1965_v10 = vld [vmem:[%s2908_s2 + $0x1f0] sm:$0xff] }
 0x1e0   :  { %523 = vmatprep.subr.mxu0 %v1924_v1  ;;  %594 = vmatprep.subr.mxu1 %v1929_v21  ;;  %3131 = vst [vmem:[#allocation66_spill] sm:$0xff] %v1960_v5  ;;  %3132 = vst [vmem:[#allocation67_spill] sm:$0xff] %v1965_v10  ;;  %v1972_v1 = vld [vmem:[%s2908_s2 + $0x1a8] sm:$0xff]  ;;  %v1977_v21 = vld [vmem:[%s2908_s2 + $0x1b8] sm:$0xff] }
 0x1e1   :  { %524 = vmatpush1.msra.mxu0 %v1936_v13  ;;  %595 = vmatpush1.msra.mxu1 %v1941_v6  ;;  %3133 = vst [vmem:[#allocation68_spill] sm:$0xff] %v1972_v1  ;;  %3134 = vst [vmem:[#allocation69_spill] sm:$0xff] %v1977_v21  ;;  %v1984_v13 = vld [vmem:[%s2908_s2 + $0x1a0] sm:$0xff]  ;;  %v1989_v6 = vld [vmem:[%s2908_s2 + $0x1b0] sm:$0xff] }
 0x1e2   :  { %525 = vmatprep.subr.mxu0 %v1948_v8  ;;  %596 = vmatprep.subr.mxu1 %v1953_v15  ;;  %3135 = vst [vmem:[#allocation70_spill] sm:$0xff] %v1984_v13  ;;  %3136 = vst [vmem:[#allocation71_spill] sm:$0xff] %v1989_v6  ;;  %v1996_v8 = vld [vmem:[%s2908_s2 + $0x168] sm:$0xff]  ;;  %v2001_v15 = vld [vmem:[%s2908_s2 + $0x178] sm:$0xff] }
 0x1e3   :  { %526 = vmatpush1.msra.mxu0 %v1960_v5  ;;  %597 = vmatpush1.msra.mxu1 %v1965_v10  ;;  %3137 = vst [vmem:[#allocation72_spill] sm:$0xff] %v1996_v8  ;;  %3138 = vst [vmem:[#allocation73_spill] sm:$0xff] %v2001_v15  ;;  %v2008_v5 = vld [vmem:[%s2908_s2 + $0x160] sm:$0xff]  ;;  %v2013_v10 = vld [vmem:[%s2908_s2 + $0x170] sm:$0xff] }
 0x1e4   :  { %527 = vmatprep.subr.mxu0 %v1972_v1  ;;  %598 = vmatprep.subr.mxu1 %v1977_v21  ;;  %3139 = vst [vmem:[#allocation74_spill] sm:$0xff] %v2008_v5  ;;  %3140 = vst [vmem:[#allocation75_spill] sm:$0xff] %v2013_v10  ;;  %v2020_v1 = vld [vmem:[%s2908_s2 + $0x128] sm:$0xff]  ;;  %v2025_v21 = vld [vmem:[%s2908_s2 + $0x138] sm:$0xff] }
 0x1e5   :  { %528 = vmatpush1.msra.mxu0 %v1984_v13  ;;  %599 = vmatpush1.msra.mxu1 %v1989_v6  ;;  %3141 = vst [vmem:[#allocation76_spill] sm:$0xff] %v2020_v1  ;;  %3142 = vst [vmem:[#allocation77_spill] sm:$0xff] %v2025_v21  ;;  %v2032_v13 = vld [vmem:[%s2908_s2 + $0x120] sm:$0xff]  ;;  %v2037_v6 = vld [vmem:[%s2908_s2 + $0x130] sm:$0xff] }
 0x1e6   :  { %529 = vmatprep.subr.mxu0 %v1996_v8  ;;  %600 = vmatprep.subr.mxu1 %v2001_v15  ;;  %3143 = vst [vmem:[#allocation78_spill] sm:$0xff] %v2032_v13  ;;  %3144 = vst [vmem:[#allocation79_spill] sm:$0xff] %v2037_v6  ;;  %v2044_v8 = vld [vmem:[%s2908_s2 + $0xe8] sm:$0xff]  ;;  %v2049_v15 = vld [vmem:[%s2908_s2 + $0xf8] sm:$0xff] }
 0x1e7   :  { %530 = vmatpush1.msra.mxu0 %v2008_v5  ;;  %601 = vmatpush1.msra.mxu1 %v2013_v10  ;;  %3145 = vst [vmem:[#allocation80_spill] sm:$0xff] %v2044_v8  ;;  %3146 = vst [vmem:[#allocation81_spill] sm:$0xff] %v2049_v15  ;;  %v2056_v5 = vld [vmem:[%s2908_s2 + $0xe0] sm:$0xff]  ;;  %v2061_v10 = vld [vmem:[%s2908_s2 + $0xf0] sm:$0xff] }
 0x1e8   :  { %531 = vmatprep.subr.mxu0 %v2020_v1  ;;  %602 = vmatprep.subr.mxu1 %v2025_v21  ;;  %3147 = vst [vmem:[#allocation82_spill] sm:$0xff] %v2056_v5  ;;  %3148 = vst [vmem:[#allocation83_spill] sm:$0xff] %v2061_v10  ;;  %v2068_v1 = vld [vmem:[%s2908_s2 + $0xa8] sm:$0xff]  ;;  %v2073_v21 = vld [vmem:[%s2908_s2 + $0xb8] sm:$0xff] }
 0x1e9   :  { %532 = vmatpush1.msra.mxu0 %v2032_v13  ;;  %603 = vmatpush1.msra.mxu1 %v2037_v6  ;;  %3149 = vst [vmem:[#allocation84_spill] sm:$0xff] %v2068_v1  ;;  %3150 = vst [vmem:[#allocation85_spill] sm:$0xff] %v2073_v21  ;;  %v2080_v13 = vld [vmem:[%s2908_s2 + $0xa0] sm:$0xff]  ;;  %v2085_v6 = vld [vmem:[%s2908_s2 + $0xb0] sm:$0xff] }
 0x1ea   :  { %533 = vmatprep.subr.mxu0 %v2044_v8  ;;  %604 = vmatprep.subr.mxu1 %v2049_v15  ;;  %3151 = vst [vmem:[#allocation86_spill] sm:$0xff] %v2080_v13  ;;  %3152 = vst [vmem:[#allocation87_spill] sm:$0xff] %v2085_v6  ;;  %v2092_v8 = vld [vmem:[%s2908_s2 + $0x68] sm:$0xff]  ;;  %v2097_v15 = vld [vmem:[%s2908_s2 + $0x78] sm:$0xff] }
 0x1eb   :  { %534 = vmatpush1.msra.mxu0 %v2056_v5  ;;  %605 = vmatpush1.msra.mxu1 %v2061_v10  ;;  %3153 = vst [vmem:[#allocation88_spill] sm:$0xff] %v2092_v8  ;;  %3154 = vst [vmem:[#allocation89_spill] sm:$0xff] %v2097_v15  ;;  %v2104_v5 = vld [vmem:[%s2908_s2 + $0x60] sm:$0xff]  ;;  %v2109_v10 = vld [vmem:[%s2908_s2 + $0x70] sm:$0xff] }
 0x1ec   :  { %535 = vmatprep.subr.mxu0 %v2068_v1  ;;  %606 = vmatprep.subr.mxu1 %v2073_v21  ;;  %3155 = vst [vmem:[#allocation90_spill] sm:$0xff] %v2104_v5  ;;  %3156 = vst [vmem:[#allocation91_spill] sm:$0xff] %v2109_v10  ;;  %v2116_v1 = vld [vmem:[%s2908_s2 + $0x28] sm:$0xff]  ;;  %v2121_v21 = vld [vmem:[%s2908_s2 + $0x38] sm:$0xff] }
 0x1ed   :  { %536 = vmatpush1.msra.mxu0 %v2080_v13  ;;  %607 = vmatpush1.msra.mxu1 %v2085_v6  ;;  %3157 = vst [vmem:[#allocation92_spill] sm:$0xff] %v2116_v1  ;;  %3158 = vst [vmem:[#allocation93_spill] sm:$0xff] %v2121_v21  ;;  %v2128_v13 = vld [vmem:[%s2908_s2 + $0x20] sm:$0xff]  ;;  %v2133_v6 = vld [vmem:[%s2908_s2 + $0x30] sm:$0xff] }
 0x1ee   :  { %537 = vmatprep.subr.mxu0 %v2092_v8  ;;  %608 = vmatprep.subr.mxu1 %v2097_v15  ;;  %3159 = vst [vmem:[#allocation94_spill] sm:$0xff] %v2128_v13  ;;  %3160 = vst [vmem:[#allocation95_spill] sm:$0xff] %v2133_v6  ;;  %v2140_v8 = vld [vmem:[%s2908_s2 + $0x7e8] sm:$0xff]  ;;  %v2145_v15 = vld [vmem:[%s2908_s2 + $0x7f8] sm:$0xff] }
 0x1ef   :  { %538 = vmatpush1.msra.mxu0 %v2104_v5  ;;  %609 = vmatpush1.msra.mxu1 %v2109_v10  ;;  %3161 = vst [vmem:[#allocation96_spill] sm:$0xff] %v2140_v8  ;;  %3162 = vst [vmem:[#allocation97_spill] sm:$0xff] %v2145_v15  ;;  %v2152_v5 = vld [vmem:[%s2908_s2 + $0x7e0] sm:$0xff]  ;;  %v2157_v10 = vld [vmem:[%s2908_s2 + $0x7f0] sm:$0xff] }
 0x1f0   :  { %539 = vmatprep.subr.mxu0 %v2116_v1  ;;  %610 = vmatprep.subr.mxu1 %v2121_v21  ;;  %3163 = vst [vmem:[#allocation98_spill] sm:$0xff] %v2152_v5  ;;  %3164 = vst [vmem:[#allocation99_spill] sm:$0xff] %v2157_v10  ;;  %v2164_v1 = vld [vmem:[%s2908_s2 + $0x7a8] sm:$0xff]  ;;  %v2169_v21 = vld [vmem:[%s2908_s2 + $0x7b8] sm:$0xff] }
 0x1f1   :  { %540 = vmatpush1.msra.mxu0 %v2128_v13  ;;  %611 = vmatpush1.msra.mxu1 %v2133_v6  ;;  %3165 = vst [vmem:[#allocation100_spill] sm:$0xff] %v2164_v1  ;;  %3166 = vst [vmem:[#allocation101_spill] sm:$0xff] %v2169_v21  ;;  %v2176_v13 = vld [vmem:[%s2908_s2 + $0x7a0] sm:$0xff]  ;;  %v2181_v6 = vld [vmem:[%s2908_s2 + $0x7b0] sm:$0xff] }
 0x1f2   :  { %541 = vmatprep.subr.mxu0 %v2140_v8  ;;  %612 = vmatprep.subr.mxu1 %v2145_v15  ;;  %3167 = vst [vmem:[#allocation102_spill] sm:$0xff] %v2176_v13  ;;  %3168 = vst [vmem:[#allocation103_spill] sm:$0xff] %v2181_v6  ;;  %v2188_v8 = vld [vmem:[%s2908_s2 + $0x768] sm:$0xff]  ;;  %v2193_v15 = vld [vmem:[%s2908_s2 + $0x778] sm:$0xff] }
 0x1f3   :  { %542 = vmatpush2.msra.mxu0 %v2152_v5  ;;  %613 = vmatpush2.msra.mxu1 %v2157_v10  ;;  %3169 = vst [vmem:[#allocation104_spill] sm:$0xff] %v2188_v8  ;;  %3170 = vst [vmem:[#allocation105_spill] sm:$0xff] %v2193_v15  ;;  %v2200_v5 = vld [vmem:[%s2908_s2 + $0x760] sm:$0xff]  ;;  %v2205_v10 = vld [vmem:[%s2908_s2 + $0x770] sm:$0xff] }
 0x1f4   :  { %543 = vmatprep.subr.mxu0 %v2164_v1  ;;  %614 = vmatprep.subr.mxu1 %v2169_v21  ;;  %3171 = vst [vmem:[#allocation106_spill] sm:$0xff] %v2200_v5  ;;  %3172 = vst [vmem:[#allocation107_spill] sm:$0xff] %v2205_v10  ;;  %v2212_v1 = vld [vmem:[%s2908_s2 + $0x728] sm:$0xff]  ;;  %v2217_v21 = vld [vmem:[%s2908_s2 + $0x738] sm:$0xff] }
 0x1f5   :  { %544 = vmatpush2.msra.mxu0 %v2176_v13  ;;  %615 = vmatpush2.msra.mxu1 %v2181_v6  ;;  %3173 = vst [vmem:[#allocation108_spill] sm:$0xff] %v2212_v1  ;;  %3174 = vst [vmem:[#allocation109_spill] sm:$0xff] %v2217_v21  ;;  %v2224_v13 = vld [vmem:[%s2908_s2 + $0x720] sm:$0xff]  ;;  %v2229_v6 = vld [vmem:[%s2908_s2 + $0x730] sm:$0xff] }
 0x1f6   :  { %545 = vmatprep.subr.mxu0 %v2188_v8  ;;  %616 = vmatprep.subr.mxu1 %v2193_v15  ;;  %3175 = vst [vmem:[#allocation110_spill] sm:$0xff] %v2224_v13  ;;  %3176 = vst [vmem:[#allocation111_spill] sm:$0xff] %v2229_v6  ;;  %v2236_v8 = vld [vmem:[%s2908_s2 + $0x6e8] sm:$0xff]  ;;  %v2241_v15 = vld [vmem:[%s2908_s2 + $0x6f8] sm:$0xff] }
 0x1f7   :  { %546 = vmatpush2.msra.mxu0 %v2200_v5  ;;  %617 = vmatpush2.msra.mxu1 %v2205_v10  ;;  %3177 = vst [vmem:[#allocation112_spill] sm:$0xff] %v2236_v8  ;;  %3178 = vst [vmem:[#allocation113_spill] sm:$0xff] %v2241_v15  ;;  %v2248_v5 = vld [vmem:[%s2908_s2 + $0x6e0] sm:$0xff]  ;;  %v2253_v10 = vld [vmem:[%s2908_s2 + $0x6f0] sm:$0xff] }
 0x1f8   :  { %547 = vmatprep.subr.mxu0 %v2212_v1  ;;  %618 = vmatprep.subr.mxu1 %v2217_v21  ;;  %3179 = vst [vmem:[#allocation114_spill] sm:$0xff] %v2248_v5  ;;  %3180 = vst [vmem:[#allocation115_spill] sm:$0xff] %v2253_v10  ;;  %v2260_v1 = vld [vmem:[%s2908_s2 + $0x6a8] sm:$0xff]  ;;  %v2265_v21 = vld [vmem:[%s2908_s2 + $0x6b8] sm:$0xff] }
 0x1f9   :  { %548 = vmatpush2.msra.mxu0 %v2224_v13  ;;  %619 = vmatpush2.msra.mxu1 %v2229_v6  ;;  %3181 = vst [vmem:[#allocation116_spill] sm:$0xff] %v2260_v1  ;;  %3182 = vst [vmem:[#allocation117_spill] sm:$0xff] %v2265_v21  ;;  %v2272_v13 = vld [vmem:[%s2908_s2 + $0x6a0] sm:$0xff]  ;;  %v2277_v6 = vld [vmem:[%s2908_s2 + $0x6b0] sm:$0xff] }
 0x1fa   :  { %549 = vmatprep.subr.mxu0 %v2236_v8  ;;  %620 = vmatprep.subr.mxu1 %v2241_v15  ;;  %3183 = vst [vmem:[#allocation118_spill] sm:$0xff] %v2272_v13  ;;  %3184 = vst [vmem:[#allocation119_spill] sm:$0xff] %v2277_v6  ;;  %v2284_v8 = vld [vmem:[%s2908_s2 + $0x668] sm:$0xff]  ;;  %v2289_v15 = vld [vmem:[%s2908_s2 + $0x678] sm:$0xff] }
 0x1fb   :  { %550 = vmatpush2.msra.mxu0 %v2248_v5  ;;  %621 = vmatpush2.msra.mxu1 %v2253_v10  ;;  %3185 = vst [vmem:[#allocation120_spill] sm:$0xff] %v2284_v8  ;;  %3186 = vst [vmem:[#allocation121_spill] sm:$0xff] %v2289_v15  ;;  %v2296_v5 = vld [vmem:[%s2908_s2 + $0x660] sm:$0xff]  ;;  %v2301_v10 = vld [vmem:[%s2908_s2 + $0x670] sm:$0xff] }
 0x1fc   :  { %551 = vmatprep.subr.mxu0 %v2260_v1  ;;  %622 = vmatprep.subr.mxu1 %v2265_v21  ;;  %3187 = vst [vmem:[#allocation122_spill] sm:$0xff] %v2296_v5  ;;  %3188 = vst [vmem:[#allocation123_spill] sm:$0xff] %v2301_v10  ;;  %v2308_v1 = vld [vmem:[%s2908_s2 + $0x628] sm:$0xff]  ;;  %v2313_v21 = vld [vmem:[%s2908_s2 + $0x638] sm:$0xff] }
 0x1fd   :  { %552 = vmatpush2.msra.mxu0 %v2272_v13  ;;  %623 = vmatpush2.msra.mxu1 %v2277_v6  ;;  %3189 = vst [vmem:[#allocation124_spill] sm:$0xff] %v2308_v1  ;;  %3190 = vst [vmem:[#allocation125_spill] sm:$0xff] %v2313_v21  ;;  %v2320_v13 = vld [vmem:[%s2908_s2 + $0x620] sm:$0xff]  ;;  %v2325_v6 = vld [vmem:[%s2908_s2 + $0x630] sm:$0xff] }
 0x1fe   :  { %553 = vmatprep.subr.mxu0 %v2284_v8  ;;  %624 = vmatprep.subr.mxu1 %v2289_v15  ;;  %3191 = vst [vmem:[#allocation126_spill] sm:$0xff] %v2320_v13  ;;  %3192 = vst [vmem:[#allocation127_spill] sm:$0xff] %v2325_v6  ;;  %v2332_v8 = vld [vmem:[%s2908_s2 + $0x5e8] sm:$0xff]  ;;  %v2337_v15 = vld [vmem:[%s2908_s2 + $0x5f8] sm:$0xff] }
 0x1ff   :  { %554 = vmatpush2.msra.mxu0 %v2296_v5  ;;  %625 = vmatpush2.msra.mxu1 %v2301_v10  ;;  %3193 = vst [vmem:[#allocation128_spill] sm:$0xff] %v2332_v8  ;;  %3194 = vst [vmem:[#allocation129_spill] sm:$0xff] %v2337_v15  ;;  %v2344_v5 = vld [vmem:[%s2908_s2 + $0x5e0] sm:$0xff]  ;;  %v2349_v10 = vld [vmem:[%s2908_s2 + $0x5f0] sm:$0xff] }
 0x200   :  { %555 = vmatprep.subr.mxu0 %v2308_v1  ;;  %626 = vmatprep.subr.mxu1 %v2313_v21  ;;  %3195 = vst [vmem:[#allocation130_spill] sm:$0xff] %v2344_v5  ;;  %3196 = vst [vmem:[#allocation131_spill] sm:$0xff] %v2349_v10  ;;  %v2356_v1 = vld [vmem:[%s2908_s2 + $0x5a8] sm:$0xff]  ;;  %v2361_v21 = vld [vmem:[%s2908_s2 + $0x5b8] sm:$0xff] }
 0x201   :  { %556 = vmatpush2.msra.mxu0 %v2320_v13  ;;  %627 = vmatpush2.msra.mxu1 %v2325_v6  ;;  %3197 = vst [vmem:[#allocation132_spill] sm:$0xff] %v2356_v1  ;;  %3198 = vst [vmem:[#allocation133_spill] sm:$0xff] %v2361_v21  ;;  %v2368_v13 = vld [vmem:[%s2908_s2 + $0x5a0] sm:$0xff]  ;;  %v2373_v6 = vld [vmem:[%s2908_s2 + $0x5b0] sm:$0xff] }
 0x202   :  { %557 = vmatprep.subr.mxu0 %v2332_v8  ;;  %628 = vmatprep.subr.mxu1 %v2337_v15  ;;  %3199 = vst [vmem:[#allocation134_spill] sm:$0xff] %v2368_v13  ;;  %3200 = vst [vmem:[#allocation135_spill] sm:$0xff] %v2373_v6  ;;  %v2380_v8 = vld [vmem:[%s2908_s2 + $0x568] sm:$0xff]  ;;  %v2385_v15 = vld [vmem:[%s2908_s2 + $0x578] sm:$0xff] }
 0x203   :  { %558 = vmatpush2.msra.mxu0 %v2344_v5  ;;  %629 = vmatpush2.msra.mxu1 %v2349_v10  ;;  %3201 = vst [vmem:[#allocation136_spill] sm:$0xff] %v2380_v8  ;;  %3202 = vst [vmem:[#allocation137_spill] sm:$0xff] %v2385_v15  ;;  %v2392_v5 = vld [vmem:[%s2908_s2 + $0x560] sm:$0xff]  ;;  %v2397_v10 = vld [vmem:[%s2908_s2 + $0x570] sm:$0xff] }
 0x204   :  { %559 = vmatprep.subr.mxu0 %v2356_v1  ;;  %630 = vmatprep.subr.mxu1 %v2361_v21  ;;  %3203 = vst [vmem:[#allocation138_spill] sm:$0xff] %v2392_v5  ;;  %3204 = vst [vmem:[#allocation139_spill] sm:$0xff] %v2397_v10  ;;  %v2404_v1 = vld [vmem:[%s2908_s2 + $0x528] sm:$0xff]  ;;  %v2409_v21 = vld [vmem:[%s2908_s2 + $0x538] sm:$0xff] }
 0x205   :  { %560 = vmatpush2.msra.mxu0 %v2368_v13  ;;  %631 = vmatpush2.msra.mxu1 %v2373_v6  ;;  %3205 = vst [vmem:[#allocation140_spill] sm:$0xff] %v2404_v1  ;;  %3206 = vst [vmem:[#allocation141_spill] sm:$0xff] %v2409_v21  ;;  %v2416_v13 = vld [vmem:[%s2908_s2 + $0x520] sm:$0xff]  ;;  %v2421_v6 = vld [vmem:[%s2908_s2 + $0x530] sm:$0xff] }
 0x206   :  { %561 = vmatprep.subr.mxu0 %v2380_v8  ;;  %632 = vmatprep.subr.mxu1 %v2385_v15  ;;  %3207 = vst [vmem:[#allocation142_spill] sm:$0xff] %v2416_v13  ;;  %3208 = vst [vmem:[#allocation143_spill] sm:$0xff] %v2421_v6  ;;  %v2428_v8 = vld [vmem:[%s2908_s2 + $0x4e8] sm:$0xff]  ;;  %v2433_v15 = vld [vmem:[%s2908_s2 + $0x4f8] sm:$0xff] }
 0x207   :  { %562 = vmatpush2.msra.mxu0 %v2392_v5  ;;  %633 = vmatpush2.msra.mxu1 %v2397_v10  ;;  %3209 = vst [vmem:[#allocation144_spill] sm:$0xff] %v2428_v8  ;;  %3210 = vst [vmem:[#allocation145_spill] sm:$0xff] %v2433_v15  ;;  %v2440_v5 = vld [vmem:[%s2908_s2 + $0x4e0] sm:$0xff]  ;;  %v2445_v10 = vld [vmem:[%s2908_s2 + $0x4f0] sm:$0xff] }
 0x208   :  { %563 = vmatprep.subr.mxu0 %v2404_v1  ;;  %634 = vmatprep.subr.mxu1 %v2409_v21  ;;  %3211 = vst [vmem:[#allocation146_spill] sm:$0xff] %v2440_v5  ;;  %3212 = vst [vmem:[#allocation147_spill] sm:$0xff] %v2445_v10  ;;  %v2452_v1 = vld [vmem:[%s2908_s2 + $0x4a8] sm:$0xff]  ;;  %v2457_v21 = vld [vmem:[%s2908_s2 + $0x4b8] sm:$0xff] }
 0x209   :  { %564 = vmatpush2.msra.mxu0 %v2416_v13  ;;  %635 = vmatpush2.msra.mxu1 %v2421_v6  ;;  %3213 = vst [vmem:[#allocation148_spill] sm:$0xff] %v2452_v1  ;;  %3214 = vst [vmem:[#allocation149_spill] sm:$0xff] %v2457_v21  ;;  %v2464_v13 = vld [vmem:[%s2908_s2 + $0x4a0] sm:$0xff]  ;;  %v2469_v6 = vld [vmem:[%s2908_s2 + $0x4b0] sm:$0xff] }
 0x20a   :  { %565 = vmatprep.subr.mxu0 %v2428_v8  ;;  %636 = vmatprep.subr.mxu1 %v2433_v15  ;;  %3215 = vst [vmem:[#allocation150_spill] sm:$0xff] %v2464_v13  ;;  %3216 = vst [vmem:[#allocation151_spill] sm:$0xff] %v2469_v6  ;;  %v2476_v8 = vld [vmem:[%s2908_s2 + $0x468] sm:$0xff]  ;;  %v2481_v15 = vld [vmem:[%s2908_s2 + $0x478] sm:$0xff] }
 0x20b   :  { %566 = vmatpush2.msra.mxu0 %v2440_v5  ;;  %637 = vmatpush2.msra.mxu1 %v2445_v10  ;;  %3217 = vst [vmem:[#allocation152_spill] sm:$0xff] %v2481_v15  ;;  %v2488_v5 = vld [vmem:[%s2908_s2 + $0x460] sm:$0xff]  ;;  %v2493_v10 = vld [vmem:[%s2908_s2 + $0x470] sm:$0xff] }
 0x20c   :  { %567 = vmatprep.subr.mxu0 %v2452_v1  ;;  %638 = vmatprep.subr.mxu1 %v2457_v21  ;;  %3218 = vst [vmem:[#allocation153_spill] sm:$0xff] %v2493_v10  ;;  %v2500_v1 = vld [vmem:[%s2908_s2 + $0x428] sm:$0xff]  ;;  %v2505_v21 = vld [vmem:[%s2908_s2 + $0x438] sm:$0xff] }
 0x20d   :  { %568 = vmatpush2.msra.mxu0 %v2464_v13  ;;  %639 = vmatpush2.msra.mxu1 %v2469_v6  ;;  %3219 = vst [vmem:[#allocation154_spill] sm:$0xff] %v2505_v21  ;;  %v2512_v13 = vld [vmem:[%s2908_s2 + $0x420] sm:$0xff]  ;;  %v2517_v6 = vld [vmem:[%s2908_s2 + $0x430] sm:$0xff] }
 0x20e   :  { %569 = vmatprep.subr.mxu0 %v2476_v8  ;;  %640 = vmatprep.subr.mxu1 %v2481_v15  ;;  %3220 = vst [vmem:[#allocation155_spill] sm:$0xff] %v2512_v13  ;;  %3221 = vst [vmem:[#allocation156_spill] sm:$0xff] %v2517_v6  ;;  %v2529_v15 = vcombine.high %v1763_v11, %v1763_v11 }
 0x20f   :  { %570 = vmatpush2.msra.mxu0 %v2488_v5  ;;  %641 = vmatpush2.msra.mxu1 %v2493_v10  ;;  %v995_v10 = vld [vmem:[%s2908_s2 + $0x3c8] sm:$0xff] }
 0x210   :  { %571 = vmatprep.subr.mxu0 %v2500_v1  ;;  %642 = vmatprep.subr.mxu1 %v2505_v21  ;;  %v996_v21 = vld [vmem:[%s2908_s2 + $0x3d8] sm:$0xff] }
 0x211   :  { %572 = vmatpush2.msra.mxu0 %v2512_v13  ;;  %643 = vmatpush2.msra.mxu1 %v2517_v6  ;;  %v997_v6 = vld [vmem:[%s2908_s2 + $0x3c0] sm:$0xff]  ;;  %v1003_v13 = vld [vmem:[%s2908_s2 + $0x348] sm:$0xff] }
 0x212   :  { %574 = vmatmul.mubr.f32.vlgmr.msra.gmra.mxu0 %v1761_v12  ;;  %645 = vmatmul.mubr.f32.vlgmr.msra.gmra.mxu1 %v1761_v12  ;;  %v998_v12 = vld [vmem:[%s2908_s2 + $0x3d0] sm:$0xff] }
 0x213   :  { %674 = vmatprep.subr.mxu0 %v995_v10  ;;  %745 = vmatprep.subr.mxu1 %v996_v21  ;;  %v999_v10 = vld [vmem:[%s2908_s2 + $0x388] sm:$0xff]  ;;  %v1000_v21 = vld [vmem:[%s2908_s2 + $0x398] sm:$0xff] }
 0x214   :  { %675 = vmatpush1.msra.mxu0 %v997_v6  ;;  %738 = vmatprep.mubr.f32.mxu0 %v2529_v15  ;;  %v1001_v6 = vld [vmem:[%s2908_s2 + $0x380] sm:$0xff] }
 0x215   :  { %746 = vmatpush1.msra.mxu1 %v998_v12  ;;  %809 = vmatprep.mubr.f32.mxu1 %v2529_v15  ;;  %v1002_v12 = vld [vmem:[%s2908_s2 + $0x390] sm:$0xff] }
 0x216   :  { %676 = vmatprep.subr.mxu0 %v999_v10  ;;  %747 = vmatprep.subr.mxu1 %v1000_v21  ;;  %v1004_v10 = vld [vmem:[%s2908_s2 + $0x358] sm:$0xff]  ;;  %v1005_v21 = vld [vmem:[%s2908_s2 + $0x340] sm:$0xff] }
 0x217   :  { %677 = vmatpush1.msra.mxu0 %v1001_v6  ;;  %748 = vmatpush1.msra.mxu1 %v1002_v12  ;;  %v1006_v6 = vld [vmem:[%s2908_s2 + $0x350] sm:$0xff]  ;;  %v1007_v12 = vld [vmem:[%s2908_s2 + $0x308] sm:$0xff] }
 0x218   :  { %678 = vmatprep.subr.mxu0 %v1003_v13  ;;  %749 = vmatprep.subr.mxu1 %v1004_v10  ;;  %v1008_v13 = vld [vmem:[%s2908_s2 + $0x318] sm:$0xff]  ;;  %v1009_v10 = vld [vmem:[%s2908_s2 + $0x300] sm:$0xff] }
 0x219   :  { %679 = vmatpush1.msra.mxu0 %v1005_v21  ;;  %750 = vmatpush1.msra.mxu1 %v1006_v6  ;;  %v1010_v21 = vld [vmem:[%s2908_s2 + $0x310] sm:$0xff]  ;;  %v1011_v6 = vld [vmem:[%s2908_s2 + $0x2c8] sm:$0xff] }
 0x21a   :  { %680 = vmatprep.subr.mxu0 %v1007_v12  ;;  %751 = vmatprep.subr.mxu1 %v1008_v13  ;;  %v1012_v12 = vld [vmem:[%s2908_s2 + $0x2d8] sm:$0xff]  ;;  %v1013_v13 = vld [vmem:[%s2908_s2 + $0x2c0] sm:$0xff] }
 0x21b   :  { %681 = vmatpush1.msra.mxu0 %v1009_v10  ;;  %752 = vmatpush1.msra.mxu1 %v1010_v21  ;;  %v1014_v10 = vld [vmem:[%s2908_s2 + $0x2d0] sm:$0xff]  ;;  %v1015_v21 = vld [vmem:[%s2908_s2 + $0x288] sm:$0xff] }
 0x21c   :  { %682 = vmatprep.subr.mxu0 %v1011_v6  ;;  %753 = vmatprep.subr.mxu1 %v1012_v12  ;;  %v1016_v6 = vld [vmem:[%s2908_s2 + $0x298] sm:$0xff]  ;;  %v1017_v12 = vld [vmem:[%s2908_s2 + $0x280] sm:$0xff] }
 0x21d   :  { %683 = vmatpush1.msra.mxu0 %v1013_v13  ;;  %754 = vmatpush1.msra.mxu1 %v1014_v10  ;;  %v1018_v13 = vld [vmem:[%s2908_s2 + $0x290] sm:$0xff]  ;;  %v1019_v10 = vld [vmem:[%s2908_s2 + $0x248] sm:$0xff] }
 0x21e   :  { %684 = vmatprep.subr.mxu0 %v1015_v21  ;;  %755 = vmatprep.subr.mxu1 %v1016_v6  ;;  %v1020_v21 = vld [vmem:[%s2908_s2 + $0x258] sm:$0xff]  ;;  %v1021_v6 = vld [vmem:[%s2908_s2 + $0x240] sm:$0xff] }
 0x21f   :  { %685 = vmatpush1.msra.mxu0 %v1017_v12  ;;  %756 = vmatpush1.msra.mxu1 %v1018_v13  ;;  %v1022_v12 = vld [vmem:[%s2908_s2 + $0x250] sm:$0xff]  ;;  %v1023_v13 = vld [vmem:[%s2908_s2 + $0x208] sm:$0xff] }
 0x220   :  { %686 = vmatprep.subr.mxu0 %v1019_v10  ;;  %757 = vmatprep.subr.mxu1 %v1020_v21  ;;  %v1024_v10 = vld [vmem:[%s2908_s2 + $0x218] sm:$0xff]  ;;  %v1025_v21 = vld [vmem:[%s2908_s2 + $0x200] sm:$0xff] }
 0x221   :  { %687 = vmatpush1.msra.mxu0 %v1021_v6  ;;  %758 = vmatpush1.msra.mxu1 %v1022_v12  ;;  %v1026_v6 = vld [vmem:[%s2908_s2 + $0x210] sm:$0xff]  ;;  %v1027_v12 = vld [vmem:[%s2908_s2 + $0x1c8] sm:$0xff] }
 0x222   :  { %688 = vmatprep.subr.mxu0 %v1023_v13  ;;  %759 = vmatprep.subr.mxu1 %v1024_v10  ;;  %v1028_v13 = vld [vmem:[%s2908_s2 + $0x1d8] sm:$0xff]  ;;  %v1029_v10 = vld [vmem:[%s2908_s2 + $0x1c0] sm:$0xff] }
 0x223   :  { %689 = vmatpush1.msra.mxu0 %v1025_v21  ;;  %760 = vmatpush1.msra.mxu1 %v1026_v6  ;;  %v1030_v21 = vld [vmem:[%s2908_s2 + $0x1d0] sm:$0xff]  ;;  %v1031_v6 = vld [vmem:[%s2908_s2 + $0x188] sm:$0xff] }
 0x224   :  { %690 = vmatprep.subr.mxu0 %v1027_v12  ;;  %761 = vmatprep.subr.mxu1 %v1028_v13  ;;  %v1032_v12 = vld [vmem:[%s2908_s2 + $0x198] sm:$0xff]  ;;  %v1033_v13 = vld [vmem:[%s2908_s2 + $0x180] sm:$0xff] }
 0x225   :  { %691 = vmatpush1.msra.mxu0 %v1029_v10  ;;  %762 = vmatpush1.msra.mxu1 %v1030_v21  ;;  %v1034_v10 = vld [vmem:[%s2908_s2 + $0x190] sm:$0xff]  ;;  %v1035_v21 = vld [vmem:[%s2908_s2 + $0x148] sm:$0xff] }
 0x226   :  { %692 = vmatprep.subr.mxu0 %v1031_v6  ;;  %763 = vmatprep.subr.mxu1 %v1032_v12  ;;  %v1036_v6 = vld [vmem:[%s2908_s2 + $0x158] sm:$0xff]  ;;  %v1037_v12 = vld [vmem:[%s2908_s2 + $0x140] sm:$0xff] }
 0x227   :  { %693 = vmatpush1.msra.mxu0 %v1033_v13  ;;  %764 = vmatpush1.msra.mxu1 %v1034_v10  ;;  %v1038_v13 = vld [vmem:[%s2908_s2 + $0x150] sm:$0xff]  ;;  %v3277_v10 = vld [vmem:[#allocation57_spill] sm:$0xff] }
 0x228   :  { %694 = vmatprep.subr.mxu0 %v1035_v21  ;;  %765 = vmatprep.subr.mxu1 %v1036_v6  ;;  %v3278_v21 = vld [vmem:[#allocation58_spill] sm:$0xff]  ;;  %v3279_v6 = vld [vmem:[#allocation59_spill] sm:$0xff] }
 0x229   :  { %695 = vmatpush1.msra.mxu0 %v1037_v12  ;;  %766 = vmatpush1.msra.mxu1 %v1038_v13  ;;  %v3280_v12 = vld [vmem:[#allocation60_spill] sm:$0xff]  ;;  %v3281_v13 = vld [vmem:[#allocation61_spill] sm:$0xff] }
 0x22a   :  { %696 = vmatprep.subr.mxu0 %v1235_v18  ;;  %767 = vmatprep.subr.mxu1 %v1240_v20  ;;  %v3222_v18 = vld [vmem:[#allocation2_spill] sm:$0xff]  ;;  %v3223_v20 = vld [vmem:[#allocation3_spill] sm:$0xff] }
 0x22b   :  { %697 = vmatpush1.msra.mxu0 %v1245_v22  ;;  %768 = vmatpush1.msra.mxu1 %v1250_v23  ;;  %v3224_v22 = vld [vmem:[#allocation4_spill] sm:$0xff]  ;;  %v3225_v23 = vld [vmem:[#allocation5_spill] sm:$0xff] }
 0x22c   :  { %698 = vmatprep.subr.mxu0 %v1255_v24  ;;  %769 = vmatprep.subr.mxu1 %v1260_v25  ;;  %v3226_v24 = vld [vmem:[#allocation6_spill] sm:$0xff]  ;;  %v3227_v25 = vld [vmem:[#allocation7_spill] sm:$0xff] }
 0x22d   :  { %699 = vmatpush1.msra.mxu0 %v1267_v26  ;;  %770 = vmatpush1.msra.mxu1 %v1272_v27  ;;  %v3228_v26 = vld [vmem:[#allocation8_spill] sm:$0xff]  ;;  %v3229_v27 = vld [vmem:[#allocation9_spill] sm:$0xff] }
 0x22e   :  { %700 = vmatprep.subr.mxu0 %v1279_v28  ;;  %771 = vmatprep.subr.mxu1 %v1284_v29  ;;  %v3230_v28 = vld [vmem:[#allocation10_spill] sm:$0xff]  ;;  %v3231_v29 = vld [vmem:[#allocation11_spill] sm:$0xff] }
 0x22f   :  { %701 = vmatpush1.msra.mxu0 %v1291_v30  ;;  %772 = vmatpush1.msra.mxu1 %v1296_v31  ;;  %v3232_v30 = vld [vmem:[#allocation12_spill] sm:$0xff]  ;;  %v3233_v31 = vld [vmem:[#allocation13_spill] sm:$0xff] }
 0x230   :  { %702 = vmatprep.subr.mxu0 %v1303_v32  ;;  %773 = vmatprep.subr.mxu1 %v1308_v33  ;;  %v3234_v32 = vld [vmem:[#allocation14_spill] sm:$0xff]  ;;  %v3235_v33 = vld [vmem:[#allocation15_spill] sm:$0xff] }
 0x231   :  { %703 = vmatpush1.msra.mxu0 %v1315_v34  ;;  %774 = vmatpush1.msra.mxu1 %v1320_v35  ;;  %v3236_v34 = vld [vmem:[#allocation16_spill] sm:$0xff]  ;;  %v3237_v35 = vld [vmem:[#allocation17_spill] sm:$0xff] }
 0x232   :  { %704 = vmatprep.subr.mxu0 %v1327_v36  ;;  %775 = vmatprep.subr.mxu1 %v1332_v37  ;;  %v3238_v36 = vld [vmem:[#allocation18_spill] sm:$0xff]  ;;  %v3239_v37 = vld [vmem:[#allocation19_spill] sm:$0xff] }
 0x233   :  { %705 = vmatpush1.msra.mxu0 %v1339_v38  ;;  %776 = vmatpush1.msra.mxu1 %v1344_v39  ;;  %v3240_v38 = vld [vmem:[#allocation20_spill] sm:$0xff]  ;;  %v3241_v39 = vld [vmem:[#allocation21_spill] sm:$0xff] }
 0x234   :  { %706 = vmatprep.subr.mxu0 %v1351_v40  ;;  %777 = vmatprep.subr.mxu1 %v1356_v41  ;;  %v3242_v40 = vld [vmem:[#allocation22_spill] sm:$0xff]  ;;  %v3243_v41 = vld [vmem:[#allocation23_spill] sm:$0xff] }
 0x235   :  { %707 = vmatpush2.msra.mxu0 %v1363_v42  ;;  %778 = vmatpush2.msra.mxu1 %v1368_v43  ;;  %v3244_v42 = vld [vmem:[#allocation24_spill] sm:$0xff]  ;;  %v3245_v43 = vld [vmem:[#allocation25_spill] sm:$0xff] }
 0x236   :  { %708 = vmatprep.subr.mxu0 %v1375_v44  ;;  %779 = vmatprep.subr.mxu1 %v1380_v45  ;;  %v3246_v44 = vld [vmem:[#allocation26_spill] sm:$0xff]  ;;  %v3247_v45 = vld [vmem:[#allocation27_spill] sm:$0xff] }
 0x237   :  { %709 = vmatpush2.msra.mxu0 %v1387_v46  ;;  %780 = vmatpush2.msra.mxu1 %v1392_v47  ;;  %v3248_v46 = vld [vmem:[#allocation28_spill] sm:$0xff]  ;;  %v3249_v47 = vld [vmem:[#allocation29_spill] sm:$0xff] }
 0x238   :  { %710 = vmatprep.subr.mxu0 %v1399_v48  ;;  %781 = vmatprep.subr.mxu1 %v1404_v49  ;;  %v3250_v48 = vld [vmem:[#allocation30_spill] sm:$0xff]  ;;  %v3251_v49 = vld [vmem:[#allocation31_spill] sm:$0xff] }
 0x239   :  { %711 = vmatpush2.msra.mxu0 %v1411_v50  ;;  %782 = vmatpush2.msra.mxu1 %v1416_v51  ;;  %v3252_v50 = vld [vmem:[#allocation32_spill] sm:$0xff]  ;;  %v3253_v51 = vld [vmem:[#allocation33_spill] sm:$0xff] }
 0x23a   :  { %712 = vmatprep.subr.mxu0 %v1423_v52  ;;  %783 = vmatprep.subr.mxu1 %v1428_v53  ;;  %v3254_v52 = vld [vmem:[#allocation34_spill] sm:$0xff]  ;;  %v3255_v53 = vld [vmem:[#allocation35_spill] sm:$0xff] }
 0x23b   :  { %713 = vmatpush2.msra.mxu0 %v1435_v54  ;;  %784 = vmatpush2.msra.mxu1 %v1440_v55  ;;  %v3256_v54 = vld [vmem:[#allocation36_spill] sm:$0xff]  ;;  %v3257_v55 = vld [vmem:[#allocation37_spill] sm:$0xff] }
 0x23c   :  { %714 = vmatprep.subr.mxu0 %v1447_v56  ;;  %785 = vmatprep.subr.mxu1 %v1452_v57  ;;  %v3258_v56 = vld [vmem:[#allocation38_spill] sm:$0xff]  ;;  %v3259_v57 = vld [vmem:[#allocation39_spill] sm:$0xff] }
 0x23d   :  { %715 = vmatpush2.msra.mxu0 %v1459_v58  ;;  %786 = vmatpush2.msra.mxu1 %v1464_v59  ;;  %v3260_v58 = vld [vmem:[#allocation40_spill] sm:$0xff]  ;;  %v3261_v59 = vld [vmem:[#allocation41_spill] sm:$0xff] }
 0x23e   :  { %716 = vmatprep.subr.mxu0 %v1471_v60  ;;  %787 = vmatprep.subr.mxu1 %v1476_v61  ;;  %v3262_v60 = vld [vmem:[#allocation42_spill] sm:$0xff]  ;;  %v3263_v61 = vld [vmem:[#allocation43_spill] sm:$0xff] }
 0x23f   :  { %717 = vmatpush2.msra.mxu0 %v1483_v62  ;;  %788 = vmatpush2.msra.mxu1 %v1488_v63  ;;  %v3264_v62 = vld [vmem:[#allocation44_spill] sm:$0xff]  ;;  %v3265_v63 = vld [vmem:[#allocation45_spill] sm:$0xff] }
 0x240   :  { %718 = vmatprep.subr.mxu0 %v1495_v2  ;;  %789 = vmatprep.subr.mxu1 %v1500_v3  ;;  %v3266_v2 = vld [vmem:[#allocation46_spill] sm:$0xff]  ;;  %v3267_v3 = vld [vmem:[#allocation47_spill] sm:$0xff] }
 0x241   :  { %719 = vmatpush2.msra.mxu0 %v1507_v4  ;;  %790 = vmatpush2.msra.mxu1 %v3222_v18  ;;  %v3268_v4 = vld [vmem:[#allocation48_spill] sm:$0xff]  ;;  %v3282_v18 = vld [vmem:[#allocation62_spill] sm:$0xff] }
 0x242   :  { %720 = vmatprep.subr.mxu0 %v3223_v20  ;;  %791 = vmatprep.subr.mxu1 %v3224_v22  ;;  %v3283_v20 = vld [vmem:[#allocation63_spill] sm:$0xff]  ;;  %v3284_v22 = vld [vmem:[#allocation64_spill] sm:$0xff] }
 0x243   :  { %721 = vmatpush2.msra.mxu0 %v3225_v23  ;;  %792 = vmatpush2.msra.mxu1 %v3226_v24  ;;  %v3285_v23 = vld [vmem:[#allocation65_spill] sm:$0xff]  ;;  %v3286_v24 = vld [vmem:[#allocation66_spill] sm:$0xff] }
 0x244   :  { %722 = vmatprep.subr.mxu0 %v3227_v25  ;;  %793 = vmatprep.subr.mxu1 %v3228_v26  ;;  %v3287_v25 = vld [vmem:[#allocation67_spill] sm:$0xff]  ;;  %v3288_v26 = vld [vmem:[#allocation68_spill] sm:$0xff] }
 0x245   :  { %723 = vmatpush2.msra.mxu0 %v3229_v27  ;;  %794 = vmatpush2.msra.mxu1 %v3230_v28  ;;  %v3289_v27 = vld [vmem:[#allocation69_spill] sm:$0xff]  ;;  %v3290_v28 = vld [vmem:[#allocation70_spill] sm:$0xff] }
 0x246   :  { %724 = vmatprep.subr.mxu0 %v3231_v29  ;;  %795 = vmatprep.subr.mxu1 %v3232_v30  ;;  %v3291_v29 = vld [vmem:[#allocation71_spill] sm:$0xff]  ;;  %v3292_v30 = vld [vmem:[#allocation72_spill] sm:$0xff] }
 0x247   :  { %725 = vmatpush2.msra.mxu0 %v1579_v16  ;;  %796 = vmatpush2.msra.mxu1 %v1584_v17  ;;  %v3269_v16 = vld [vmem:[#allocation49_spill] sm:$0xff]  ;;  %v3270_v17 = vld [vmem:[#allocation50_spill] sm:$0xff] }
 0x248   :  { %726 = vmatprep.subr.mxu0 %v3233_v31  ;;  %797 = vmatprep.subr.mxu1 %v3234_v32  ;;  %v3293_v31 = vld [vmem:[#allocation73_spill] sm:$0xff]  ;;  %v3294_v32 = vld [vmem:[#allocation74_spill] sm:$0xff] }
 0x249   :  { %727 = vmatpush2.msra.mxu0 %v3235_v33  ;;  %798 = vmatpush2.msra.mxu1 %v3236_v34  ;;  %v3295_v33 = vld [vmem:[#allocation75_spill] sm:$0xff]  ;;  %v3296_v34 = vld [vmem:[#allocation76_spill] sm:$0xff] }
 0x24a   :  { %728 = vmatprep.subr.mxu0 %v3237_v35  ;;  %799 = vmatprep.subr.mxu1 %v3238_v36  ;;  %v3297_v35 = vld [vmem:[#allocation77_spill] sm:$0xff]  ;;  %v3298_v36 = vld [vmem:[#allocation78_spill] sm:$0xff] }
 0x24b   :  { %729 = vmatpush2.msra.mxu0 %v3239_v37  ;;  %800 = vmatpush2.msra.mxu1 %v3240_v38  ;;  %v3299_v37 = vld [vmem:[#allocation79_spill] sm:$0xff]  ;;  %v3300_v38 = vld [vmem:[#allocation80_spill] sm:$0xff] }
 0x24c   :  { %730 = vmatprep.subr.mxu0 %v3241_v39  ;;  %801 = vmatprep.subr.mxu1 %v3242_v40  ;;  %v3301_v39 = vld [vmem:[#allocation81_spill] sm:$0xff]  ;;  %v3302_v40 = vld [vmem:[#allocation82_spill] sm:$0xff] }
 0x24d   :  { %731 = vmatpush2.msra.mxu0 %v3243_v41  ;;  %802 = vmatpush2.msra.mxu1 %v3244_v42  ;;  %v3303_v41 = vld [vmem:[#allocation83_spill] sm:$0xff]  ;;  %v3304_v42 = vld [vmem:[#allocation84_spill] sm:$0xff] }
 0x24e   :  { %732 = vmatprep.subr.mxu0 %v3245_v43  ;;  %803 = vmatprep.subr.mxu1 %v3246_v44  ;;  %v3305_v43 = vld [vmem:[#allocation85_spill] sm:$0xff]  ;;  %v3306_v44 = vld [vmem:[#allocation86_spill] sm:$0xff] }
 0x24f   :  { %733 = vmatpush2.msra.mxu0 %v3247_v45  ;;  %804 = vmatpush2.msra.mxu1 %v3248_v46  ;;  %v3307_v45 = vld [vmem:[#allocation87_spill] sm:$0xff]  ;;  %v3308_v46 = vld [vmem:[#allocation88_spill] sm:$0xff] }
 0x250   :  { %734 = vmatprep.subr.mxu0 %v3249_v47  ;;  %805 = vmatprep.subr.mxu1 %v3250_v48  ;;  %v3309_v47 = vld [vmem:[#allocation89_spill] sm:$0xff]  ;;  %v3310_v48 = vld [vmem:[#allocation90_spill] sm:$0xff] }
 0x251   :  { %735 = vmatpush2.msra.mxu0 %v3251_v49  ;;  %806 = vmatpush2.msra.mxu1 %v3252_v50  ;;  %v3311_v49 = vld [vmem:[#allocation91_spill] sm:$0xff]  ;;  %v3312_v50 = vld [vmem:[#allocation92_spill] sm:$0xff] }
 0x252   :  { %736 = vmatprep.subr.mxu0 %v3253_v51  ;;  %807 = vmatprep.subr.mxu1 %v3254_v52  ;;  %v3313_v51 = vld [vmem:[#allocation93_spill] sm:$0xff]  ;;  %v3314_v52 = vld [vmem:[#allocation94_spill] sm:$0xff] }
 0x253   :  { %737 = vmatpush2.msra.mxu0 %v1733_v9  ;;  %808 = vmatpush2.msra.mxu1 %v3255_v53  ;;  %v3273_v9 = vld [vmem:[#allocation53_spill] sm:$0xff]  ;;  %v3315_v53 = vld [vmem:[#allocation95_spill] sm:$0xff] }
 0x254   :  { %739 = vmatmul.mubr.f32.vlgmr.msra.gmra.mxu0 %v1763_v11  ;;  %810 = vmatmul.mubr.f32.vlgmr.msra.gmra.mxu1 %v1763_v11 }
 0x255   :  { %816 = vmatprep.subr.mxu0 %v1746_v7  ;;  %887 = vmatprep.subr.mxu1 %v3256_v54  ;;  %v3271_v7 = vld [vmem:[#allocation51_spill] sm:$0xff]  ;;  %v3316_v54 = vld [vmem:[#allocation96_spill] sm:$0xff] }
 0x256   :  { %817 = vmatpush1.msra.mxu0 %v1770_v14  ;;  %880 = vmatprep.mubr.f32.mxu0 %v2529_v15  ;;  %v3272_v14 = vld [vmem:[#allocation52_spill] sm:$0xff] }
 0x257   :  { %888 = vmatpush1.msra.mxu1 %v1775_v0  ;;  %951 = vmatprep.mubr.f32.mxu1 %v2529_v15  ;;  %v3274_v0 = vld [vmem:[#allocation54_spill] sm:$0xff]  ;;  %v3276_v15 = vld [vmem:[#allocation56_spill] sm:$0xff] }
 0x258   :  { %818 = vmatprep.subr.mxu0 %v3257_v55  ;;  %889 = vmatprep.subr.mxu1 %v1787_v19  ;;  %v3275_v19 = vld [vmem:[#allocation55_spill] sm:$0xff]  ;;  %v3317_v55 = vld [vmem:[#allocation97_spill] sm:$0xff] }
 0x259   :  { %819 = vmatpush1.msra.mxu0 %v3258_v56  ;;  %890 = vmatpush1.msra.mxu1 %v3259_v57  ;;  %v3318_v56 = vld [vmem:[#allocation98_spill] sm:$0xff]  ;;  %v3319_v57 = vld [vmem:[#allocation99_spill] sm:$0xff] }
 0x25a   :  { %820 = vmatprep.subr.mxu0 %v3260_v58  ;;  %891 = vmatprep.subr.mxu1 %v3261_v59  ;;  %v3320_v58 = vld [vmem:[#allocation100_spill] sm:$0xff]  ;;  %v3321_v59 = vld [vmem:[#allocation101_spill] sm:$0xff] }
 0x25b   :  { %821 = vmatpush1.msra.mxu0 %v3262_v60  ;;  %892 = vmatpush1.msra.mxu1 %v3263_v61  ;;  %v3322_v60 = vld [vmem:[#allocation102_spill] sm:$0xff]  ;;  %v3323_v61 = vld [vmem:[#allocation103_spill] sm:$0xff] }
 0x25c   :  { %822 = vmatprep.subr.mxu0 %v3264_v62  ;;  %893 = vmatprep.subr.mxu1 %v3265_v63  ;;  %v3324_v62 = vld [vmem:[#allocation104_spill] sm:$0xff]  ;;  %v3325_v63 = vld [vmem:[#allocation105_spill] sm:$0xff] }
 0x25d   :  { %823 = vmatpush1.msra.mxu0 %v3266_v2  ;;  %894 = vmatpush1.msra.mxu1 %v3267_v3  ;;  %v3326_v2 = vld [vmem:[#allocation106_spill] sm:$0xff]  ;;  %v3327_v3 = vld [vmem:[#allocation107_spill] sm:$0xff] }
 0x25e   :  { %824 = vmatprep.subr.mxu0 %v3268_v4  ;;  %895 = vmatprep.subr.mxu1 %v3269_v16  ;;  %v3328_v4 = vld [vmem:[#allocation108_spill] sm:$0xff]  ;;  %v3329_v16 = vld [vmem:[#allocation109_spill] sm:$0xff] }
 0x25f   :  { %825 = vmatpush1.msra.mxu0 %v3270_v17  ;;  %896 = vmatpush1.msra.mxu1 %v3271_v7  ;;  %v3330_v17 = vld [vmem:[#allocation110_spill] sm:$0xff]  ;;  %v3331_v7 = vld [vmem:[#allocation111_spill] sm:$0xff] }
 0x260   :  { %826 = vmatprep.subr.mxu0 %v3272_v14  ;;  %897 = vmatprep.subr.mxu1 %v3273_v9  ;;  %v3332_v14 = vld [vmem:[#allocation112_spill] sm:$0xff]  ;;  %v3333_v9 = vld [vmem:[#allocation113_spill] sm:$0xff] }
 0x261   :  { %827 = vmatpush1.msra.mxu0 %v3274_v0  ;;  %898 = vmatpush1.msra.mxu1 %v3275_v19  ;;  %v3334_v0 = vld [vmem:[#allocation114_spill] sm:$0xff]  ;;  %v3335_v19 = vld [vmem:[#allocation115_spill] sm:$0xff] }
 0x262   :  { %828 = vmatprep.subr.mxu0 %v3276_v15  ;;  %899 = vmatprep.subr.mxu1 %v3277_v10  ;;  %v3336_v15 = vld [vmem:[#allocation116_spill] sm:$0xff]  ;;  %v3337_v10 = vld [vmem:[#allocation117_spill] sm:$0xff] }
 0x263   :  { %829 = vmatpush1.msra.mxu0 %v3278_v21  ;;  %900 = vmatpush1.msra.mxu1 %v3279_v6  ;;  %v3338_v21 = vld [vmem:[#allocation118_spill] sm:$0xff]  ;;  %v3339_v6 = vld [vmem:[#allocation119_spill] sm:$0xff] }
 0x264   :  { %830 = vmatprep.subr.mxu0 %v3280_v12  ;;  %901 = vmatprep.subr.mxu1 %v3281_v13  ;;  %v3340_v12 = vld [vmem:[#allocation120_spill] sm:$0xff]  ;;  %v3341_v13 = vld [vmem:[#allocation121_spill] sm:$0xff] }
 0x265   :  { %831 = vmatpush1.msra.mxu0 %v3282_v18  ;;  %902 = vmatpush1.msra.mxu1 %v3283_v20  ;;  %v3342_v18 = vld [vmem:[#allocation122_spill] sm:$0xff]  ;;  %v3343_v20 = vld [vmem:[#allocation123_spill] sm:$0xff] }
 0x266   :  { %832 = vmatprep.subr.mxu0 %v3284_v22  ;;  %903 = vmatprep.subr.mxu1 %v3285_v23  ;;  %v3344_v22 = vld [vmem:[#allocation124_spill] sm:$0xff]  ;;  %v3345_v23 = vld [vmem:[#allocation125_spill] sm:$0xff] }
 0x267   :  { %833 = vmatpush1.msra.mxu0 %v3286_v24  ;;  %904 = vmatpush1.msra.mxu1 %v3287_v25  ;;  %v3346_v24 = vld [vmem:[#allocation126_spill] sm:$0xff]  ;;  %v3347_v25 = vld [vmem:[#allocation127_spill] sm:$0xff] }
 0x268   :  { %834 = vmatprep.subr.mxu0 %v3288_v26  ;;  %905 = vmatprep.subr.mxu1 %v3289_v27  ;;  %v3348_v26 = vld [vmem:[#allocation128_spill] sm:$0xff]  ;;  %v3349_v27 = vld [vmem:[#allocation129_spill] sm:$0xff] }
 0x269   :  { %835 = vmatpush1.msra.mxu0 %v3290_v28  ;;  %906 = vmatpush1.msra.mxu1 %v3291_v29  ;;  %v3350_v28 = vld [vmem:[#allocation130_spill] sm:$0xff]  ;;  %v3351_v29 = vld [vmem:[#allocation131_spill] sm:$0xff] }
 0x26a   :  { %836 = vmatprep.subr.mxu0 %v3292_v30  ;;  %907 = vmatprep.subr.mxu1 %v3293_v31  ;;  %v3352_v30 = vld [vmem:[#allocation132_spill] sm:$0xff]  ;;  %v3353_v31 = vld [vmem:[#allocation133_spill] sm:$0xff] }
 0x26b   :  { %837 = vmatpush1.msra.mxu0 %v3294_v32  ;;  %908 = vmatpush1.msra.mxu1 %v3295_v33  ;;  %v3354_v32 = vld [vmem:[#allocation134_spill] sm:$0xff]  ;;  %v3355_v33 = vld [vmem:[#allocation135_spill] sm:$0xff] }
 0x26c   :  { %838 = vmatprep.subr.mxu0 %v3296_v34  ;;  %909 = vmatprep.subr.mxu1 %v3297_v35  ;;  %v3356_v34 = vld [vmem:[#allocation136_spill] sm:$0xff]  ;;  %v3357_v35 = vld [vmem:[#allocation137_spill] sm:$0xff] }
 0x26d   :  { %839 = vmatpush1.msra.mxu0 %v3298_v36  ;;  %910 = vmatpush1.msra.mxu1 %v3299_v37  ;;  %v3358_v36 = vld [vmem:[#allocation138_spill] sm:$0xff]  ;;  %v3359_v37 = vld [vmem:[#allocation139_spill] sm:$0xff] }
 0x26e   :  { %840 = vmatprep.subr.mxu0 %v3300_v38  ;;  %911 = vmatprep.subr.mxu1 %v3301_v39  ;;  %v3360_v38 = vld [vmem:[#allocation140_spill] sm:$0xff]  ;;  %v3361_v39 = vld [vmem:[#allocation141_spill] sm:$0xff] }
 0x26f   :  { %841 = vmatpush1.msra.mxu0 %v3302_v40  ;;  %912 = vmatpush1.msra.mxu1 %v3303_v41  ;;  %v3362_v40 = vld [vmem:[#allocation142_spill] sm:$0xff]  ;;  %v3363_v41 = vld [vmem:[#allocation143_spill] sm:$0xff] }
 0x270   :  { %842 = vmatprep.subr.mxu0 %v3304_v42  ;;  %913 = vmatprep.subr.mxu1 %v3305_v43  ;;  %v3364_v42 = vld [vmem:[#allocation144_spill] sm:$0xff]  ;;  %v3365_v43 = vld [vmem:[#allocation145_spill] sm:$0xff] }
 0x271   :  { %843 = vmatpush1.msra.mxu0 %v3306_v44  ;;  %914 = vmatpush1.msra.mxu1 %v3307_v45  ;;  %v3366_v44 = vld [vmem:[#allocation146_spill] sm:$0xff]  ;;  %v3367_v45 = vld [vmem:[#allocation147_spill] sm:$0xff] }
 0x272   :  { %844 = vmatprep.subr.mxu0 %v3308_v46  ;;  %915 = vmatprep.subr.mxu1 %v3309_v47  ;;  %v3368_v46 = vld [vmem:[#allocation148_spill] sm:$0xff]  ;;  %v3369_v47 = vld [vmem:[#allocation149_spill] sm:$0xff] }
 0x273   :  { %845 = vmatpush1.msra.mxu0 %v3310_v48  ;;  %916 = vmatpush1.msra.mxu1 %v3311_v49  ;;  %v3370_v48 = vld [vmem:[#allocation150_spill] sm:$0xff]  ;;  %v3371_v49 = vld [vmem:[#allocation151_spill] sm:$0xff] }
 0x274   :  { %846 = vmatprep.subr.mxu0 %v3312_v50  ;;  %917 = vmatprep.subr.mxu1 %v3313_v51 }
 0x275   :  { %847 = vmatpush1.msra.mxu0 %v3314_v52  ;;  %918 = vmatpush1.msra.mxu1 %v3315_v53  ;;  %v3372_v52 = vld [vmem:[#allocation152_spill] sm:$0xff]  ;;  %v3373_v53 = vld [vmem:[#allocation153_spill] sm:$0xff] }
 0x276   :  { %848 = vmatprep.subr.mxu0 %v3316_v54  ;;  %919 = vmatprep.subr.mxu1 %v3317_v55 }
 0x277   :  { %849 = vmatpush2.msra.mxu0 %v3318_v56  ;;  %920 = vmatpush2.msra.mxu1 %v3319_v57  ;;  %v3374_v56 = vld [vmem:[#allocation154_spill] sm:$0xff] }
 0x278   :  { %850 = vmatprep.subr.mxu0 %v3320_v58  ;;  %921 = vmatprep.subr.mxu1 %v3321_v59  ;;  %v3375_v59 = vld [vmem:[#allocation155_spill] sm:$0xff] }
 0x279   :  { %851 = vmatpush2.msra.mxu0 %v3322_v60  ;;  %922 = vmatpush2.msra.mxu1 %v3323_v61  ;;  %v3376_v60 = vld [vmem:[#allocation156_spill] sm:$0xff] }
 0x27a   :  { %852 = vmatprep.subr.mxu0 %v3324_v62  ;;  %923 = vmatprep.subr.mxu1 %v3325_v63 }
 0x27b   :  { %853 = vmatpush2.msra.mxu0 %v3326_v2  ;;  %924 = vmatpush2.msra.mxu1 %v3327_v3 }
 0x27c   :  { %854 = vmatprep.subr.mxu0 %v3328_v4  ;;  %925 = vmatprep.subr.mxu1 %v3329_v16 }
 0x27d   :  { %855 = vmatpush2.msra.mxu0 %v3330_v17  ;;  %926 = vmatpush2.msra.mxu1 %v3331_v7 }
 0x27e   :  { %856 = vmatprep.subr.mxu0 %v3332_v14  ;;  %927 = vmatprep.subr.mxu1 %v3333_v9 }
 0x27f   :  { %857 = vmatpush2.msra.mxu0 %v3334_v0  ;;  %928 = vmatpush2.msra.mxu1 %v3335_v19 }
 0x280   :  { %858 = vmatprep.subr.mxu0 %v3336_v15  ;;  %929 = vmatprep.subr.mxu1 %v3337_v10 }
 0x281   :  { %859 = vmatpush2.msra.mxu0 %v3338_v21  ;;  %930 = vmatpush2.msra.mxu1 %v3339_v6 }
 0x282   :  { %860 = vmatprep.subr.mxu0 %v3340_v12  ;;  %931 = vmatprep.subr.mxu1 %v3341_v13 }
 0x283   :  { %861 = vmatpush2.msra.mxu0 %v3342_v18  ;;  %932 = vmatpush2.msra.mxu1 %v3343_v20 }
 0x284   :  { %862 = vmatprep.subr.mxu0 %v3344_v22  ;;  %933 = vmatprep.subr.mxu1 %v3345_v23 }
 0x285   :  { %863 = vmatpush2.msra.mxu0 %v3346_v24  ;;  %934 = vmatpush2.msra.mxu1 %v3347_v25 }
 0x286   :  { %864 = vmatprep.subr.mxu0 %v3348_v26  ;;  %935 = vmatprep.subr.mxu1 %v3349_v27 }
 0x287   :  { %865 = vmatpush2.msra.mxu0 %v3350_v28  ;;  %936 = vmatpush2.msra.mxu1 %v3351_v29 }
 0x288   :  { %866 = vmatprep.subr.mxu0 %v3352_v30  ;;  %937 = vmatprep.subr.mxu1 %v3353_v31 }
 0x289   :  { %867 = vmatpush2.msra.mxu0 %v3354_v32  ;;  %938 = vmatpush2.msra.mxu1 %v3355_v33 }
 0x28a   :  { %868 = vmatprep.subr.mxu0 %v3356_v34  ;;  %939 = vmatprep.subr.mxu1 %v3357_v35 }
 0x28b   :  { %869 = vmatpush2.msra.mxu0 %v3358_v36  ;;  %940 = vmatpush2.msra.mxu1 %v3359_v37 }
 0x28c   :  { %870 = vmatprep.subr.mxu0 %v3360_v38  ;;  %941 = vmatprep.subr.mxu1 %v3361_v39 }
 0x28d   :  { %871 = vmatpush2.msra.mxu0 %v3362_v40  ;;  %942 = vmatpush2.msra.mxu1 %v3363_v41 }
 0x28e   :  { %872 = vmatprep.subr.mxu0 %v3364_v42  ;;  %943 = vmatprep.subr.mxu1 %v3365_v43 }
 0x28f   :  { %873 = vmatpush2.msra.mxu0 %v3366_v44  ;;  %944 = vmatpush2.msra.mxu1 %v3367_v45 }
 0x290   :  { %874 = vmatprep.subr.mxu0 %v3368_v46  ;;  %945 = vmatprep.subr.mxu1 %v3369_v47 }
 0x291   :  { %875 = vmatpush2.msra.mxu0 %v3370_v48  ;;  %946 = vmatpush2.msra.mxu1 %v3371_v49  ;;  %v433_v50 = vpop.f32.mrf.mxu0  ;;  %v504_v51 = vpop.f32.mrf.mxu1 }
 0x292   :  { %876 = vmatprep.subr.mxu0 %v2476_v8  ;;  %947 = vmatprep.subr.mxu1 %v3372_v52 }
 0x293   :  { %877 = vmatpush2.msra.mxu0 %v2488_v5  ;;  %948 = vmatpush2.msra.mxu1 %v3373_v53  ;;  %v435_v54 = vpop.f32.mrf.mxu0  ;;  %v506_v55 = vpop.f32.mrf.mxu1 }
 0x294   :  { %878 = vmatprep.subr.mxu0 %v2500_v1  ;;  %949 = vmatprep.subr.mxu1 %v3374_v56  ;;  %v659_v57 = vcombine.low %v433_v50, %v435_v54  ;;  %v660_v58 = vcombine.low %v504_v51, %v506_v55 }
 0x295   :  { %879 = vmatpush2.msra.mxu0 %v3375_v59  ;;  %950 = vmatpush2.msra.mxu1 %v3376_v60 }
 0x296   :  { %881 = vmatmul.mubr.f32.vlgmr.msra.gmra.mxu0 %v1763_v11  ;;  %952 = vmatmul.mubr.f32.vlgmr.msra.gmra.mxu1 %v1763_v11  ;;  %667 = vst [vmem:[%s2911_s4] sm:$0xff] %v659_v57  ;;  %668 = vst [vmem:[%s2911_s4 + $0x8] sm:$0xff] %v660_v58 }
 0x2d2   :  { %v575_v1 = vpop.f32.mrf.mxu0  ;;  %v646_v8 = vpop.f32.mrf.mxu1 }
 0x2d4   :  { %v577_v5 = vpop.f32.mrf.mxu0  ;;  %v648_v61 = vpop.f32.mrf.mxu1 }
 0x2d5   :  { %v661_v62 = vcombine.low %v575_v1, %v577_v5  ;;  %v662_v63 = vcombine.low %v646_v8, %v648_v61 }
 0x2d7   :  { %669 = vst [vmem:[%s2911_s4 + $0x10] sm:$0xff] %v661_v62  ;;  %670 = vst [vmem:[%s2911_s4 + $0x18] sm:$0xff] %v662_v63 }
 0x314   :  { %v740_v11 = vpop.f32.mrf.mxu0  ;;  %v811_v2 = vpop.f32.mrf.mxu1 }
 0x316   :  { %v742_v3 = vpop.f32.mrf.mxu0  ;;  %v813_v4 = vpop.f32.mrf.mxu1 }
 0x317   :  { %v966_v16 = vcombine.low %v740_v11, %v742_v3  ;;  %v967_v17 = vcombine.low %v811_v2, %v813_v4 }
 0x319   :  { %983 = vst [vmem:[%s2911_s4 + $0x20] sm:$0xff] %v966_v16  ;;  %984 = vst [vmem:[%s2911_s4 + $0x28] sm:$0xff] %v967_v17 }
 0x356   :  { %v882_v7 = vpop.f32.mrf.mxu0  ;;  %v953_v14 = vpop.f32.mrf.mxu1 }
 0x358   :  { %v884_v9 = vpop.f32.mrf.mxu0  ;;  %v955_v0 = vpop.f32.mrf.mxu1 }
 0x359   :  { %v968_v19 = vcombine.low %v882_v7, %v884_v9  ;;  %v969_v15 = vcombine.low %v953_v14, %v955_v0 }
 0x35b   :  { %985 = vst [vmem:[%s2911_s4 + $0x30] sm:$0xff] %v968_v19  ;;  %986 = vst [vmem:[%s2911_s4 + $0x38] sm:$0xff] %v969_v15 }

</bundles_post_ra>
